<compile_context>
chip_gen: v6e
topology: v6e:2x2x1
jax: 0.10.0
libtpu: 0.0.40
codegen_flags: <defaults>
</compile_context>

<pallas_src>
import math
import functools

import jax
import jax.numpy as jnp
from jax.experimental import pallas as pl
from jax.experimental.pallas import tpu as pltpu


def _encoder_stack_kernel(x_ref, pos_ref,
                          wqkv_ref, bqkv_ref, wo_ref, bo_ref,
                          ln1w_ref, ln1b_ref,
                          w1_ref, b1_ref, w2_ref, b2_ref,
                          ln2w_ref, ln2b_ref,
                          out_ref, *, num_heads):
    """One grid step = (batch element b, encoder layer l)."""
    S, D = x_ref.shape[1], x_ref.shape[2]
    H = num_heads
    Dh = D // H

    # Layer 0: seed the resident activation block with the input. For l > 0 the output
    # block (same block index across the layer axis) still holds the previous layer's
    # result in VMEM, so there is no HBM round-trip between layers.
    @pl.when(pl.program_id(1) == 0)
    def _():
        out_ref[...] = x_ref[...]

    x = out_ref[0].astype(jnp.float32)        # (S, D) current activations, f32
    pos = pos_ref[0].astype(jnp.float32)      # (S, D)

    # --- self attention: q = k = x + pos (1/sqrt(Dh) pre-folded into Wq/bq), v = x ---
    wqkv = wqkv_ref[0]                        # (D, 3D)  bf16
    bqkv = bqkv_ref[0]                        # (1, 3D)  f32

    qk_in = (x + pos).astype(jnp.bfloat16)
    x_bf = x.astype(jnp.bfloat16)

    qk = jnp.dot(qk_in, wqkv[:, :2 * D],
                 preferred_element_type=jnp.float32) + bqkv[:, :2 * D]   # (S, 2D) f32
    v = jnp.dot(x_bf, wqkv[:, 2 * D:],
                preferred_element_type=jnp.float32) + bqkv[:, 2 * D:]    # (S, D)  f32

    # Heads-batched attention: leading head axis, batched einsums on the MXU.
    qh = qk[:, :D].reshape(S, H, Dh).transpose(1, 0, 2).astype(jnp.bfloat16)  # (H,S,Dh)
    kh = qk[:, D:].reshape(S, H, Dh).transpose(1, 0, 2).astype(jnp.bfloat16)
    vh = v.reshape(S, H, Dh).transpose(1, 0, 2).astype(jnp.bfloat16)

    s = jnp.einsum('hqd,hkd->hqk', qh, kh,
                   preferred_element_type=jnp.float32)                   # (H,S,S) f32
    s = s - jnp.max(s, axis=-1, keepdims=True)
    p = jnp.exp(s)
    p = p * pl.reciprocal(jnp.sum(p, axis=-1, keepdims=True), approx=True)
    o = jnp.einsum('hqk,hkd->hqd', p.astype(jnp.bfloat16), vh,
                   preferred_element_type=jnp.float32)                   # (H,S,Dh) f32
    attn = o.transpose(1, 0, 2).reshape(S, D)                            # (S, D)

    attn = jnp.dot(attn.astype(jnp.bfloat16), wo_ref[0],
                   preferred_element_type=jnp.float32) + bo_ref[0]

    # residual + LayerNorm1 (dropout is identity in eval mode) -- f32 math
    src = x + attn
    mu = jnp.mean(src, axis=-1, keepdims=True)
    var = jnp.mean(jnp.square(src - mu), axis=-1, keepdims=True)
    src = (src - mu) * jax.lax.rsqrt(var + 1e-5) * ln1w_ref[0] + ln1b_ref[0]

    # --- feed-forward ---
    h1 = jnp.dot(src.astype(jnp.bfloat16), w1_ref[0],
                 preferred_element_type=jnp.float32) + b1_ref[0]
    h1 = jnp.maximum(h1, 0.0)                                            # ReLU
    ffn = jnp.dot(h1.astype(jnp.bfloat16), w2_ref[0],
                  preferred_element_type=jnp.float32) + b2_ref[0]

    # residual + LayerNorm2 -- f32 math
    y = src + ffn
    mu2 = jnp.mean(y, axis=-1, keepdims=True)
    var2 = jnp.mean(jnp.square(y - mu2), axis=-1, keepdims=True)
    y = (y - mu2) * jax.lax.rsqrt(var2 + 1e-5) * ln2w_ref[0] + ln2b_ref[0]

    out_ref[0] = y.astype(out_ref.dtype)


def _prep_params(layer_params, num_heads):
    """Stack per-layer params on a leading layer axis, fold 1/sqrt(Dh) into the q
    projection, and cast matmul weights to bf16 (biases / LN params stay f32)."""
    D = layer_params[0]["wqkv"].shape[0]
    Dh = D // num_heads
    scale = 1.0 / math.sqrt(Dh)
    col_scale = jnp.concatenate(
        [jnp.full((D,), scale, jnp.float32), jnp.ones((2 * D,), jnp.float32)])

    def stack(name, dtype, scale_cols=False):
        arrs = []
        for lp in layer_params:
            a = lp[name].astype(jnp.float32)
            if scale_cols:
                a = a * col_scale[None, :]
            arrs.append(a)
        return jnp.stack(arrs, axis=0).astype(dtype)

    return {
        "wqkv": stack("wqkv", jnp.bfloat16, scale_cols=True),   # (L, D, 3D)
        "bqkv": stack("bqkv", jnp.float32, scale_cols=True),    # (L, 1, 3D)
        "wo":   stack("wo", jnp.bfloat16),                      # (L, D, D)
        "bo":   stack("bo", jnp.float32),                       # (L, 1, D)
        "ln1w": stack("ln1w", jnp.float32),
        "ln1b": stack("ln1b", jnp.float32),
        "w1":   stack("w1", jnp.bfloat16),                      # (L, D, F)
        "b1":   stack("b1", jnp.float32),                       # (L, 1, F)
        "w2":   stack("w2", jnp.bfloat16),                      # (L, F, D)
        "b2":   stack("b2", jnp.float32),
        "ln2w": stack("ln2w", jnp.float32),
        "ln2b": stack("ln2b", jnp.float32),
    }


def transformer_encoder(src, pos, layer_params, num_heads):
    """TransformerEncoder.forward (mask / key_padding_mask = None, norm = None).

    src, pos: [S, B, D] (PyTorch seq-first layout). Returns [S, B, D].
    """
    # TODO(synk): attn_mask / src_key_padding_mask not supported (passed as None upstream).
    if not layer_params:
        return src

    x = jnp.transpose(src, (1, 0, 2))   # -> [B, S, D]
    p = jnp.transpose(pos, (1, 0, 2))
    B, S, D = x.shape
    L = len(layer_params)
    F = layer_params[0]["w1"].shape[1]

    params = _prep_params(layer_params, num_heads)
    kernel = functools.partial(_encoder_stack_kernel, num_heads=num_heads)

    def wspec(*shape):
        # per-layer weight slab, selected by the layer grid axis
        nd = len(shape)

        def idx(b, l):
            return (l,) + (0,) * nd

        return pl.BlockSpec((1,) + shape, idx)

    act_spec = pl.BlockSpec((1, S, D), lambda b, l: (b, 0, 0))

    out = pl.pallas_call(
        kernel,
        out_shape=jax.ShapeDtypeStruct((B, S, D), x.dtype),
        grid=(B, L),
        in_specs=[
            act_spec,                 # x   (fetched once per batch element)
            act_spec,                 # pos
            wspec(D, 3 * D),          # wqkv (bf16, q-scale folded)
            wspec(1, 3 * D),          # bqkv
            wspec(D, D),              # wo
            wspec(1, D),              # bo
            wspec(1, D),              # ln1 weight
            wspec(1, D),              # ln1 bias
            wspec(D, F),              # w1
            wspec(1, F),              # b1
            wspec(F, D),              # w2
            wspec(1, D),              # b2
            wspec(1, D),              # ln2 weight
            wspec(1, D),              # ln2 bias
        ],
        out_specs=act_spec,
        compiler_params=pltpu.CompilerParams(
            dimension_semantics=("parallel", "arbitrary"),
            vmem_limit_bytes=48 * 1024 * 1024),
    )(x, p,
      params["wqkv"], params["bqkv"], params["wo"], params["bo"],
      params["ln1w"], params["ln1b"], params["w1"], params["b1"],
      params["w2"], params["b2"], params["ln2w"], params["ln2b"])

    return jnp.transpose(out, (1, 0, 2))  # -> [S, B, D]


def init_layer_params(key, d_model, dim_feedforward):
    ks = jax.random.split(key, 4)
    s = 0.02
    return {
        "wqkv": jax.random.normal(ks[0], (d_model, 3 * d_model), jnp.float32) * s,
        "bqkv": jnp.zeros((1, 3 * d_model), jnp.float32),
        "wo":   jax.random.normal(ks[1], (d_model, d_model), jnp.float32) * s,
        "bo":   jnp.zeros((1, d_model), jnp.float32),
        "ln1w": jnp.ones((1, d_model), jnp.float32),
        "ln1b": jnp.zeros((1, d_model), jnp.float32),
        "w1":   jax.random.normal(ks[2], (d_model, dim_feedforward), jnp.float32) * s,
        "b1":   jnp.zeros((1, dim_feedforward), jnp.float32),
        "w2":   jax.random.normal(ks[3], (dim_feedforward, d_model), jnp.float32) * s,
        "b2":   jnp.zeros((1, d_model), jnp.float32),
        "ln2w": jnp.ones((1, d_model), jnp.float32),
        "ln2b": jnp.zeros((1, d_model), jnp.float32),
    }


if __name__ == "__main__":
    SEQ, BATCH, D_MODEL = 8, 2, 32
    NUM_HEADS, DIM_FF, NUM_LAYERS = 4, 64, 2

    key = jax.random.PRNGKey(0)
    k_src, k_pos, k_par = jax.random.split(key, 3)

    src = jax.random.normal(k_src, (SEQ, BATCH, D_MODEL), jnp.float32)
    pos = jax.random.normal(k_pos, (SEQ, BATCH, D_MODEL), jnp.float32)

    layer_keys = jax.random.split(k_par, NUM_LAYERS)
    layer_params = [init_layer_params(k, D_MODEL, DIM_FF) for k in layer_keys]

    out = transformer_encoder(src, pos, layer_params, NUM_HEADS)
    out = jax.block_until_ready(out)
    assert out.shape == (SEQ, BATCH, D_MODEL)
    assert bool(jnp.all(jnp.isfinite(out)))
    print("KERNEL_OK")
</pallas_src>

<mosaic_0001>
module attributes {stable_mosaic.version = 11 : i64} {
  func.func @_encoder_stack_kernel(%arg0: i32, %arg1: i32, %arg2: memref<1x8x32xf32, #tpu.memory_space<vmem>>, %arg3: memref<1x8x32xf32, #tpu.memory_space<vmem>>, %arg4: memref<1x32x96xbf16, #tpu.memory_space<vmem>>, %arg5: memref<1x1x96xf32, #tpu.memory_space<vmem>>, %arg6: memref<1x32x32xbf16, #tpu.memory_space<vmem>>, %arg7: memref<1x1x32xf32, #tpu.memory_space<vmem>>, %arg8: memref<1x1x32xf32, #tpu.memory_space<vmem>>, %arg9: memref<1x1x32xf32, #tpu.memory_space<vmem>>, %arg10: memref<1x32x64xbf16, #tpu.memory_space<vmem>>, %arg11: memref<1x1x64xf32, #tpu.memory_space<vmem>>, %arg12: memref<1x64x32xbf16, #tpu.memory_space<vmem>>, %arg13: memref<1x1x32xf32, #tpu.memory_space<vmem>>, %arg14: memref<1x1x32xf32, #tpu.memory_space<vmem>>, %arg15: memref<1x1x32xf32, #tpu.memory_space<vmem>>, %arg16: memref<1x8x32xf32, #tpu.memory_space<vmem>>) attributes {dimension_semantics = [#tpu.dimension_semantics<parallel>, #tpu.dimension_semantics<arbitrary>], iteration_bounds = array<i64: 2, 2>, scalar_prefetch = 0 : i64, scratch_operands = 0 : i64, tpu.core_type = #tpu.core_type<tc>, window_params = [{transform_indices = @transform_0, window_bounds = array<i64: 1, 8, 32>}, {transform_indices = @transform_1, window_bounds = array<i64: 1, 8, 32>}, {transform_indices = @transform_2, window_bounds = array<i64: 1, 32, 96>}, {transform_indices = @transform_3, window_bounds = array<i64: 1, 1, 96>}, {transform_indices = @transform_4, window_bounds = array<i64: 1, 32, 32>}, {transform_indices = @transform_5, window_bounds = array<i64: 1, 1, 32>}, {transform_indices = @transform_6, window_bounds = array<i64: 1, 1, 32>}, {transform_indices = @transform_7, window_bounds = array<i64: 1, 1, 32>}, {transform_indices = @transform_8, window_bounds = array<i64: 1, 32, 64>}, {transform_indices = @transform_9, window_bounds = array<i64: 1, 1, 64>}, {transform_indices = @transform_10, window_bounds = array<i64: 1, 64, 32>}, {transform_indices = @transform_11, window_bounds = array<i64: 1, 1, 32>}, {transform_indices = @transform_12, window_bounds = array<i64: 1, 1, 32>}, {transform_indices = @transform_13, window_bounds = array<i64: 1, 1, 32>}, {transform_indices = @transform_14, window_bounds = array<i64: 1, 8, 32>}]} {
    %c0_i32 = arith.constant 0 : i32
    %0 = arith.cmpi eq, %arg1, %c0_i32 : i32
    %1 = arith.extui %0 : i1 to i32
    %c0_i32_0 = arith.constant 0 : i32
    %2 = arith.cmpi ne, %1, %c0_i32_0 : i32
    scf.if %2 {
      %c0_64 = arith.constant 0 : index
      %c0_65 = arith.constant 0 : index
      %c0_66 = arith.constant 0 : index
      %133 = vector.load %arg2[%c0_64, %c0_65, %c0_66] : memref<1x8x32xf32, #tpu.memory_space<vmem>>, vector<1x8x32xf32>
      %c0_67 = arith.constant 0 : index
      %c0_68 = arith.constant 0 : index
      %c0_69 = arith.constant 0 : index
      %134 = vector.load %arg16[%c0_67, %c0_68, %c0_69] : memref<1x8x32xf32, #tpu.memory_space<vmem>>, vector<1x8x32xf32>
      tpu.vector_store %arg16[%c0_67, %c0_68, %c0_69], %133 {strides = array<i32>} : memref<1x8x32xf32, #tpu.memory_space<vmem>>, vector<1x8x32xf32>,
    } else {
    }
    %c0 = arith.constant 0 : index
    %c0_1 = arith.constant 0 : index
    %c0_2 = arith.constant 0 : index
    %3 = vector.load %arg16[%c0, %c0_1, %c0_2] : memref<1x8x32xf32, #tpu.memory_space<vmem>>, vector<1x8x32xf32>
    %4 = vector.shape_cast %3 : vector<1x8x32xf32> to vector<8x32xf32>
    %c0_3 = arith.constant 0 : index
    %c0_4 = arith.constant 0 : index
    %c0_5 = arith.constant 0 : index
    %5 = vector.load %arg3[%c0_3, %c0_4, %c0_5] : memref<1x8x32xf32, #tpu.memory_space<vmem>>, vector<1x8x32xf32>
    %6 = vector.shape_cast %5 : vector<1x8x32xf32> to vector<8x32xf32>
    %c0_6 = arith.constant 0 : index
    %c0_7 = arith.constant 0 : index
    %c0_8 = arith.constant 0 : index
    %7 = vector.load %arg4[%c0_6, %c0_7, %c0_8] : memref<1x32x96xbf16, #tpu.memory_space<vmem>>, vector<1x32x96xbf16>
    %8 = vector.shape_cast %7 : vector<1x32x96xbf16> to vector<32x96xbf16>
    %c0_9 = arith.constant 0 : index
    %c0_10 = arith.constant 0 : index
    %c0_11 = arith.constant 0 : index
    %9 = vector.load %arg5[%c0_9, %c0_10, %c0_11] : memref<1x1x96xf32, #tpu.memory_space<vmem>>, vector<1x1x96xf32>
    %10 = vector.shape_cast %9 : vector<1x1x96xf32> to vector<1x96xf32>
    %11 = arith.addf %4, %6 : vector<8x32xf32>
    %12 = arith.truncf %11 : vector<8x32xf32> to vector<8x32xbf16>
    %13 = arith.truncf %4 : vector<8x32xf32> to vector<8x32xbf16>
    %14 = vector.extract_strided_slice %8 {offsets = [0, 0], sizes = [32, 64], strides = [1, 1]} : vector<32x96xbf16> to vector<32x64xbf16>
    %cst = arith.constant dense<0.000000e+00> : vector<8x64xf32>
    %15 = tpu.matmul %12, %14, %cst {dimension_numbers = #tpu.dot_dimension_numbers<[1], [0], [0], [1], [0, 0, 1, 1], [], []>} : vector<8x32xbf16>, vector<32x64xbf16>, vector<8x64xf32> -> vector<8x64xf32>
    %16 = vector.extract_strided_slice %10 {offsets = [0, 0], sizes = [1, 64], strides = [1, 1]} : vector<1x96xf32> to vector<1x64xf32>
    %17 = vector.broadcast %16 : vector<1x64xf32> to vector<8x64xf32>
    %18 = arith.addf %15, %17 : vector<8x64xf32>
    %19 = vector.extract_strided_slice %8 {offsets = [0, 64], sizes = [32, 32], strides = [1, 1]} : vector<32x96xbf16> to vector<32x32xbf16>
    %cst_12 = arith.constant dense<0.000000e+00> : vector<8x32xf32>
    %20 = tpu.matmul %13, %19, %cst_12 {dimension_numbers = #tpu.dot_dimension_numbers<[1], [0], [0], [1], [0, 0, 1, 1], [], []>} : vector<8x32xbf16>, vector<32x32xbf16>, vector<8x32xf32> -> vector<8x32xf32>
    %21 = vector.extract_strided_slice %10 {offsets = [0, 64], sizes = [1, 32], strides = [1, 1]} : vector<1x96xf32> to vector<1x32xf32>
    %22 = vector.broadcast %21 : vector<1x32xf32> to vector<8x32xf32>
    %23 = arith.addf %20, %22 : vector<8x32xf32>
    %24 = vector.extract_strided_slice %18 {offsets = [0, 0], sizes = [8, 32], strides = [1, 1]} : vector<8x64xf32> to vector<8x32xf32>
    %25 = vector.shape_cast %24 : vector<8x32xf32> to vector<8x4x8xf32>
    %26 = tpu.transpose %25, [1, 0, 2] : vector<8x4x8xf32> -> vector<4x8x8xf32>
    %27 = arith.truncf %26 : vector<4x8x8xf32> to vector<4x8x8xbf16>
    %28 = vector.extract_strided_slice %18 {offsets = [0, 32], sizes = [8, 32], strides = [1, 1]} : vector<8x64xf32> to vector<8x32xf32>
    %29 = vector.shape_cast %28 : vector<8x32xf32> to vector<8x4x8xf32>
    %30 = tpu.transpose %29, [1, 0, 2] : vector<8x4x8xf32> -> vector<4x8x8xf32>
    %31 = arith.truncf %30 : vector<4x8x8xf32> to vector<4x8x8xbf16>
    %32 = vector.shape_cast %23 : vector<8x32xf32> to vector<8x4x8xf32>
    %33 = tpu.transpose %32, [1, 0, 2] : vector<8x4x8xf32> -> vector<4x8x8xf32>
    %34 = arith.truncf %33 : vector<4x8x8xf32> to vector<4x8x8xbf16>
    "tpu.trace_start"() <{level = 10 : i32, message = "hqd,hkd->hqk"}> : () -> ()
    %cst_13 = arith.constant dense<0.000000e+00> : vector<4x8x8xf32>
    %35 = tpu.matmul %27, %31, %cst_13 {dimension_numbers = #tpu.dot_dimension_numbers<[2], [2], [1], [1], [0, 0, 0, 1, 1, 1], [0], [0]>} : vector<4x8x8xbf16>, vector<4x8x8xbf16>, vector<4x8x8xf32> -> vector<4x8x8xf32>
    "tpu.trace_stop"() : () -> ()
    %cst_14 = arith.constant dense<0xFF800000> : vector<4x8xf32>
    %36 = vector.multi_reduction <maximumf>, %35, %cst_14 [2] : vector<4x8x8xf32> to vector<4x8xf32>
    %37 = vector.shape_cast %36 : vector<4x8xf32> to vector<4x8x1xf32>
    %38 = vector.broadcast %37 : vector<4x8x1xf32> to vector<4x8x8xf32>
    %39 = arith.subf %35, %38 : vector<4x8x8xf32>
    %40 = math.exp %39 : vector<4x8x8xf32>
    %cst_15 = arith.constant dense<0.000000e+00> : vector<4x8xf32>
    %41 = vector.multi_reduction <add>, %40, %cst_15 [2] : vector<4x8x8xf32> to vector<4x8xf32>
    %42 = vector.shape_cast %41 : vector<4x8xf32> to vector<4x8x1xf32>
    %43 = tpu.reciprocal %42 {approx = true} : vector<4x8x1xf32> -> vector<4x8x1xf32>
    %44 = vector.broadcast %43 : vector<4x8x1xf32> to vector<4x8x8xf32>
    %45 = arith.mulf %40, %44 : vector<4x8x8xf32>
    %46 = arith.truncf %45 : vector<4x8x8xf32> to vector<4x8x8xbf16>
    "tpu.trace_start"() <{level = 10 : i32, message = "hqk,hkd->hqd"}> : () -> ()
    %cst_16 = arith.constant dense<0.000000e+00> : vector<4x8x8xf32>
    %47 = tpu.matmul %46, %34, %cst_16 {dimension_numbers = #tpu.dot_dimension_numbers<[2], [1], [1], [2], [0, 0, 0, 1, 1, 2], [0], [0]>} : vector<4x8x8xbf16>, vector<4x8x8xbf16>, vector<4x8x8xf32> -> vector<4x8x8xf32>
    "tpu.trace_stop"() : () -> ()
    %48 = tpu.transpose %47, [1, 0, 2] : vector<4x8x8xf32> -> vector<8x4x8xf32>
    %49 = vector.shape_cast %48 : vector<8x4x8xf32> to vector<8x32xf32>
    %50 = arith.truncf %49 : vector<8x32xf32> to vector<8x32xbf16>
    %c0_17 = arith.constant 0 : index
    %c0_18 = arith.constant 0 : index
    %c0_19 = arith.constant 0 : index
    %51 = vector.load %arg6[%c0_17, %c0_18, %c0_19] : memref<1x32x32xbf16, #tpu.memory_space<vmem>>, vector<1x32x32xbf16>
    %52 = vector.shape_cast %51 : vector<1x32x32xbf16> to vector<32x32xbf16>
    %cst_20 = arith.constant dense<0.000000e+00> : vector<8x32xf32>
    %53 = tpu.matmul %50, %52, %cst_20 {dimension_numbers = #tpu.dot_dimension_numbers<[1], [0], [0], [1], [0, 0, 1, 1], [], []>} : vector<8x32xbf16>, vector<32x32xbf16>, vector<8x32xf32> -> vector<8x32xf32>
    %c0_21 = arith.constant 0 : index
    %c0_22 = arith.constant 0 : index
    %c0_23 = arith.constant 0 : index
    %54 = vector.load %arg7[%c0_21, %c0_22, %c0_23] : memref<1x1x32xf32, #tpu.memory_space<vmem>>, vector<1x1x32xf32>
    %55 = vector.shape_cast %54 : vector<1x1x32xf32> to vector<1x32xf32>
    %56 = vector.broadcast %55 : vector<1x32xf32> to vector<8x32xf32>
    %57 = arith.addf %53, %56 : vector<8x32xf32>
    %58 = arith.addf %4, %57 : vector<8x32xf32>
    %cst_24 = arith.constant dense<0.000000e+00> : vector<8xf32>
    %59 = vector.multi_reduction <add>, %58, %cst_24 [1] : vector<8x32xf32> to vector<8xf32>
    %60 = vector.shape_cast %59 : vector<8xf32> to vector<8x1xf32>
    %cst_25 = arith.constant 3.200000e+01 : f32
    %61 = vector.broadcast %cst_25 : f32 to vector<8x1xf32>
    %62 = arith.divf %60, %61 : vector<8x1xf32>
    %63 = vector.broadcast %62 : vector<8x1xf32> to vector<8x32xf32>
    %64 = arith.subf %58, %63 : vector<8x32xf32>
    %65 = arith.mulf %64, %64 : vector<8x32xf32>
    %cst_26 = arith.constant dense<0.000000e+00> : vector<8xf32>
    %66 = vector.multi_reduction <add>, %65, %cst_26 [1] : vector<8x32xf32> to vector<8xf32>
    %67 = vector.shape_cast %66 : vector<8xf32> to vector<8x1xf32>
    %cst_27 = arith.constant 3.200000e+01 : f32
    %68 = vector.broadcast %cst_27 : f32 to vector<8x1xf32>
    %69 = arith.divf %67, %68 : vector<8x1xf32>
    %70 = vector.broadcast %62 : vector<8x1xf32> to vector<8x32xf32>
    %71 = arith.subf %58, %70 : vector<8x32xf32>
    %cst_28 = arith.constant 9.99999974E-6 : f32
    %72 = vector.broadcast %cst_28 : f32 to vector<8x1xf32>
    %73 = arith.addf %69, %72 : vector<8x1xf32>
    %74 = math.rsqrt %73 : vector<8x1xf32>
    %75 = vector.broadcast %74 : vector<8x1xf32> to vector<8x32xf32>
    %76 = arith.mulf %71, %75 : vector<8x32xf32>
    %c0_29 = arith.constant 0 : index
    %c0_30 = arith.constant 0 : index
    %c0_31 = arith.constant 0 : index
    %77 = vector.load %arg8[%c0_29, %c0_30, %c0_31] : memref<1x1x32xf32, #tpu.memory_space<vmem>>, vector<1x1x32xf32>
    %78 = vector.shape_cast %77 : vector<1x1x32xf32> to vector<1x32xf32>
    %79 = vector.broadcast %78 : vector<1x32xf32> to vector<8x32xf32>
    %80 = arith.mulf %76, %79 : vector<8x32xf32>
    %c0_32 = arith.constant 0 : index
    %c0_33 = arith.constant 0 : index
    %c0_34 = arith.constant 0 : index
    %81 = vector.load %arg9[%c0_32, %c0_33, %c0_34] : memref<1x1x32xf32, #tpu.memory_space<vmem>>, vector<1x1x32xf32>
    %82 = vector.shape_cast %81 : vector<1x1x32xf32> to vector<1x32xf32>
    %83 = vector.broadcast %82 : vector<1x32xf32> to vector<8x32xf32>
    %84 = arith.addf %80, %83 : vector<8x32xf32>
    %85 = arith.truncf %84 : vector<8x32xf32> to vector<8x32xbf16>
    %c0_35 = arith.constant 0 : index
    %c0_36 = arith.constant 0 : index
    %c0_37 = arith.constant 0 : index
    %86 = vector.load %arg10[%c0_35, %c0_36, %c0_37] : memref<1x32x64xbf16, #tpu.memory_space<vmem>>, vector<1x32x64xbf16>
    %87 = vector.shape_cast %86 : vector<1x32x64xbf16> to vector<32x64xbf16>
    %cst_38 = arith.constant dense<0.000000e+00> : vector<8x64xf32>
    %88 = tpu.matmul %85, %87, %cst_38 {dimension_numbers = #tpu.dot_dimension_numbers<[1], [0], [0], [1], [0, 0, 1, 1], [], []>} : vector<8x32xbf16>, vector<32x64xbf16>, vector<8x64xf32> -> vector<8x64xf32>
    %c0_39 = arith.constant 0 : index
    %c0_40 = arith.constant 0 : index
    %c0_41 = arith.constant 0 : index
    %89 = vector.load %arg11[%c0_39, %c0_40, %c0_41] : memref<1x1x64xf32, #tpu.memory_space<vmem>>, vector<1x1x64xf32>
    %90 = vector.shape_cast %89 : vector<1x1x64xf32> to vector<1x64xf32>
    %91 = vector.broadcast %90 : vector<1x64xf32> to vector<8x64xf32>
    %92 = arith.addf %88, %91 : vector<8x64xf32>
    %cst_42 = arith.constant 0.000000e+00 : f32
    %93 = vector.broadcast %cst_42 : f32 to vector<8x64xf32>
    %94 = arith.maximumf %92, %93 : vector<8x64xf32>
    %95 = arith.truncf %94 : vector<8x64xf32> to vector<8x64xbf16>
    %c0_43 = arith.constant 0 : index
    %c0_44 = arith.constant 0 : index
    %c0_45 = arith.constant 0 : index
    %96 = vector.load %arg12[%c0_43, %c0_44, %c0_45] : memref<1x64x32xbf16, #tpu.memory_space<vmem>>, vector<1x64x32xbf16>
    %97 = vector.shape_cast %96 : vector<1x64x32xbf16> to vector<64x32xbf16>
    %cst_46 = arith.constant dense<0.000000e+00> : vector<8x32xf32>
    %98 = tpu.matmul %95, %97, %cst_46 {dimension_numbers = #tpu.dot_dimension_numbers<[1], [0], [0], [1], [0, 0, 1, 1], [], []>} : vector<8x64xbf16>, vector<64x32xbf16>, vector<8x32xf32> -> vector<8x32xf32>
    %c0_47 = arith.constant 0 : index
    %c0_48 = arith.constant 0 : index
    %c0_49 = arith.constant 0 : index
    %99 = vector.load %arg13[%c0_47, %c0_48, %c0_49] : memref<1x1x32xf32, #tpu.memory_space<vmem>>, vector<1x1x32xf32>
    %100 = vector.shape_cast %99 : vector<1x1x32xf32> to vector<1x32xf32>
    %101 = vector.broadcast %100 : vector<1x32xf32> to vector<8x32xf32>
    %102 = arith.addf %98, %101 : vector<8x32xf32>
    %103 = arith.addf %84, %102 : vector<8x32xf32>
    %cst_50 = arith.constant dense<0.000000e+00> : vector<8xf32>
    %104 = vector.multi_reduction <add>, %103, %cst_50 [1] : vector<8x32xf32> to vector<8xf32>
    %105 = vector.shape_cast %104 : vector<8xf32> to vector<8x1xf32>
    %cst_51 = arith.constant 3.200000e+01 : f32
    %106 = vector.broadcast %cst_51 : f32 to vector<8x1xf32>
    %107 = arith.divf %105, %106 : vector<8x1xf32>
    %108 = vector.broadcast %107 : vector<8x1xf32> to vector<8x32xf32>
    %109 = arith.subf %103, %108 : vector<8x32xf32>
    %110 = arith.mulf %109, %109 : vector<8x32xf32>
    %cst_52 = arith.constant dense<0.000000e+00> : vector<8xf32>
    %111 = vector.multi_reduction <add>, %110, %cst_52 [1] : vector<8x32xf32> to vector<8xf32>
    %112 = vector.shape_cast %111 : vector<8xf32> to vector<8x1xf32>
    %cst_53 = arith.constant 3.200000e+01 : f32
    %113 = vector.broadcast %cst_53 : f32 to vector<8x1xf32>
    %114 = arith.divf %112, %113 : vector<8x1xf32>
    %115 = vector.broadcast %107 : vector<8x1xf32> to vector<8x32xf32>
    %116 = arith.subf %103, %115 : vector<8x32xf32>
    %cst_54 = arith.constant 9.99999974E-6 : f32
    %117 = vector.broadcast %cst_54 : f32 to vector<8x1xf32>
    %118 = arith.addf %114, %117 : vector<8x1xf32>
    %119 = math.rsqrt %118 : vector<8x1xf32>
    %120 = vector.broadcast %119 : vector<8x1xf32> to vector<8x32xf32>
    %121 = arith.mulf %116, %120 : vector<8x32xf32>
    %c0_55 = arith.constant 0 : index
    %c0_56 = arith.constant 0 : index
    %c0_57 = arith.constant 0 : index
    %122 = vector.load %arg14[%c0_55, %c0_56, %c0_57] : memref<1x1x32xf32, #tpu.memory_space<vmem>>, vector<1x1x32xf32>
    %123 = vector.shape_cast %122 : vector<1x1x32xf32> to vector<1x32xf32>
    %124 = vector.broadcast %123 : vector<1x32xf32> to vector<8x32xf32>
    %125 = arith.mulf %121, %124 : vector<8x32xf32>
    %c0_58 = arith.constant 0 : index
    %c0_59 = arith.constant 0 : index
    %c0_60 = arith.constant 0 : index
    %126 = vector.load %arg15[%c0_58, %c0_59, %c0_60] : memref<1x1x32xf32, #tpu.memory_space<vmem>>, vector<1x1x32xf32>
    %127 = vector.shape_cast %126 : vector<1x1x32xf32> to vector<1x32xf32>
    %128 = vector.broadcast %127 : vector<1x32xf32> to vector<8x32xf32>
    %129 = arith.addf %125, %128 : vector<8x32xf32>
    %c0_61 = arith.constant 0 : index
    %c0_62 = arith.constant 0 : index
    %c0_63 = arith.constant 0 : index
    %130 = vector.load %arg16[%c0_61, %c0_62, %c0_63] : memref<1x8x32xf32, #tpu.memory_space<vmem>>, vector<1x8x32xf32>
    %131 = vector.shape_cast %130 : vector<1x8x32xf32> to vector<8x32xf32>
    %132 = vector.shape_cast %129 : vector<8x32xf32> to vector<1x8x32xf32>
    tpu.vector_store %arg16[%c0_61, %c0_62, %c0_63], %132 {strides = array<i32>} : memref<1x8x32xf32, #tpu.memory_space<vmem>>, vector<1x8x32xf32>,
    return
  }
  func.func @transform_0(%arg0: i32, %arg1: i32) -> (i32, i32, i32) {
    %c0_i32 = arith.constant 0 : i32
    %c0_i32_0 = arith.constant 0 : i32
    %c0_i32_1 = arith.constant 0 : i32
    return %arg0, %c0_i32, %c0_i32_0 : i32, i32, i32
  }
  func.func @transform_1(%arg0: i32, %arg1: i32) -> (i32, i32, i32) {
    %c0_i32 = arith.constant 0 : i32
    %c0_i32_0 = arith.constant 0 : i32
    %c0_i32_1 = arith.constant 0 : i32
    return %arg0, %c0_i32, %c0_i32_0 : i32, i32, i32
  }
  func.func @transform_2(%arg0: i32, %arg1: i32) -> (i32, i32, i32) {
    %c0_i32 = arith.constant 0 : i32
    %c0_i32_0 = arith.constant 0 : i32
    %c0_i32_1 = arith.constant 0 : i32
    return %arg1, %c0_i32, %c0_i32_0 : i32, i32, i32
  }
  func.func @transform_3(%arg0: i32, %arg1: i32) -> (i32, i32, i32) {
    %c0_i32 = arith.constant 0 : i32
    %c0_i32_0 = arith.constant 0 : i32
    %c0_i32_1 = arith.constant 0 : i32
    return %arg1, %c0_i32, %c0_i32_0 : i32, i32, i32
  }
  func.func @transform_4(%arg0: i32, %arg1: i32) -> (i32, i32, i32) {
    %c0_i32 = arith.constant 0 : i32
    %c0_i32_0 = arith.constant 0 : i32
    %c0_i32_1 = arith.constant 0 : i32
    return %arg1, %c0_i32, %c0_i32_0 : i32, i32, i32
  }
  func.func @transform_5(%arg0: i32, %arg1: i32) -> (i32, i32, i32) {
    %c0_i32 = arith.constant 0 : i32
    %c0_i32_0 = arith.constant 0 : i32
    %c0_i32_1 = arith.constant 0 : i32
    return %arg1, %c0_i32, %c0_i32_0 : i32, i32, i32
  }
  func.func @transform_6(%arg0: i32, %arg1: i32) -> (i32, i32, i32) {
    %c0_i32 = arith.constant 0 : i32
    %c0_i32_0 = arith.constant 0 : i32
    %c0_i32_1 = arith.constant 0 : i32
    return %arg1, %c0_i32, %c0_i32_0 : i32, i32, i32
  }
  func.func @transform_7(%arg0: i32, %arg1: i32) -> (i32, i32, i32) {
    %c0_i32 = arith.constant 0 : i32
    %c0_i32_0 = arith.constant 0 : i32
    %c0_i32_1 = arith.constant 0 : i32
    return %arg1, %c0_i32, %c0_i32_0 : i32, i32, i32
  }
  func.func @transform_8(%arg0: i32, %arg1: i32) -> (i32, i32, i32) {
    %c0_i32 = arith.constant 0 : i32
    %c0_i32_0 = arith.constant 0 : i32
    %c0_i32_1 = arith.constant 0 : i32
    return %arg1, %c0_i32, %c0_i32_0 : i32, i32, i32
  }
  func.func @transform_9(%arg0: i32, %arg1: i32) -> (i32, i32, i32) {
    %c0_i32 = arith.constant 0 : i32
    %c0_i32_0 = arith.constant 0 : i32
    %c0_i32_1 = arith.constant 0 : i32
    return %arg1, %c0_i32, %c0_i32_0 : i32, i32, i32
  }
  func.func @transform_10(%arg0: i32, %arg1: i32) -> (i32, i32, i32) {
    %c0_i32 = arith.constant 0 : i32
    %c0_i32_0 = arith.constant 0 : i32
    %c0_i32_1 = arith.constant 0 : i32
    return %arg1, %c0_i32, %c0_i32_0 : i32, i32, i32
  }
  func.func @transform_11(%arg0: i32, %arg1: i32) -> (i32, i32, i32) {
    %c0_i32 = arith.constant 0 : i32
    %c0_i32_0 = arith.constant 0 : i32
    %c0_i32_1 = arith.constant 0 : i32
    return %arg1, %c0_i32, %c0_i32_0 : i32, i32, i32
  }
  func.func @transform_12(%arg0: i32, %arg1: i32) -> (i32, i32, i32) {
    %c0_i32 = arith.constant 0 : i32
    %c0_i32_0 = arith.constant 0 : i32
    %c0_i32_1 = arith.constant 0 : i32
    return %arg1, %c0_i32, %c0_i32_0 : i32, i32, i32
  }
  func.func @transform_13(%arg0: i32, %arg1: i32) -> (i32, i32, i32) {
    %c0_i32 = arith.constant 0 : i32
    %c0_i32_0 = arith.constant 0 : i32
    %c0_i32_1 = arith.constant 0 : i32
    return %arg1, %c0_i32, %c0_i32_0 : i32, i32, i32
  }
  func.func @transform_14(%arg0: i32, %arg1: i32) -> (i32, i32, i32) {
    %c0_i32 = arith.constant 0 : i32
    %c0_i32_0 = arith.constant 0 : i32
    %c0_i32_1 = arith.constant 0 : i32
    return %arg0, %c0_i32, %c0_i32_0 : i32, i32, i32
  }
}

</mosaic_0001>

<bundles_post_ra>
// kernel: tpu_custom_call.1
= control target key start
LH: loop header
LB: loop body
LE: loop exit
PB: predicated region body
PF: predicated region fallthrough
CT: control target
= control target key end

     0   :  { %s3460_s0 = inlined_call_operand.hbm [shape: f32[2,8,32], index: 0, kind: input, shape index: {}]   ;;  %s3461_s1 = inlined_call_operand.hbm [shape: f32[2,8,32], index: 1, kind: input, shape index: {}]   ;;  %s3462_s2 = inlined_call_operand.vmem [shape: bf16[2,32,96], index: 2, kind: input, shape index: {}]   ;;  %s3463_s3 = inlined_call_operand.vmem [shape: f32[2,1,96], index: 3, kind: input, shape index: {}]   ;;  %s3464_s4 = inlined_call_operand.vmem [shape: bf16[2,32,32], index: 4, kind: input, shape index: {}]   ;;  %s3465_s5 = inlined_call_operand.vmem [shape: f32[2,1,32], index: 5, kind: input, shape index: {}]   ;;  %s3466_s6 = inlined_call_operand.vmem [shape: f32[2,1,32], index: 6, kind: input, shape index: {}]   ;;  %s3467_s7 = inlined_call_operand.vmem [shape: f32[2,1,32], index: 7, kind: input, shape index: {}]   ;;  %s3468_s8 = inlined_call_operand.vmem [shape: bf16[2,32,64], index: 8, kind: input, shape index: {}]   ;;  %s3469_s9 = inlined_call_operand.vmem [shape: f32[2,1,64], index: 9, kind: input, shape index: {}]   ;;  %s3470_s10 = inlined_call_operand.vmem [shape: bf16[2,64,32], index: 10, kind: input, shape index: {}]   ;;  %s3471_s11 = inlined_call_operand.vmem [shape: f32[2,1,32], index: 11, kind: input, shape index: {}]   ;;  %s3472_s12 = inlined_call_operand.vmem [shape: f32[2,1,32], index: 12, kind: input, shape index: {}]   ;;  %s3473_s13 = inlined_call_operand.vmem [shape: f32[2,1,32], index: 13, kind: input, shape index: {}]   ;;  %s3474_s14 = inlined_call_operand.hbm [shape: f32[2,8,32], index: 14, kind: output, shape index: {}]  }
   0x1   :  { %3488 = sst [smem:[#allocation24_spill]] %s3460_s0 }
   0x2   :  { %3489 = sst [smem:[#allocation25_spill]] %s3461_s1 }
   0x3   :  { %3490 = sst [smem:[#allocation26_spill]] %s3462_s2 }
   0x4   :  { %3491 = sst [smem:[#allocation27_spill]] %s3464_s4 }
   0x5   :  { %3492 = sst [smem:[#allocation28_spill]] %s3467_s7 }
   0x6   :  { %3493 = sst [smem:[#allocation29_spill]] %s3468_s8 }
   0x7   :  { %3494 = sst [smem:[#allocation30_spill]] %s3472_s12 }
   0x8   :  { %3495 = sst [smem:[#allocation31_spill]] %s3473_s13 }
   0x9   :  { %3496 = sst [smem:[#allocation32_spill]] %s3474_s14 }
   0xa   :  { %19 = vsyncpa [#allocation3], 0 }
   0xb   :  { %21 = vsyncpa [#allocation3 + $0x1], 0 }
   0xc   :  { %22 = vsyncpa [#allocation6], 0 }
   0xd   :  { %24 = vsyncpa [#allocation6 + $0x1], 0 }
   0xe   :  { %25 = vsyncpa [#allocation4], 0 }
   0xf   :  { %27 = vsyncpa [#allocation4 + $0x1], 0  ;;  %s2964_s29 = smov 0   ;;  %s2966_s30 = smov 0  }
  0x10   :  { %s2968_s15 = smov 0   ;;  %s2970_s16 = smov 0  }
  0x11   :  { %s2972_s17 = smov 0   ;;  %s2974_s18 = smov 0  }
  0x12   :  { %s2976_s19 = smov 0   ;;  %s2978_s20 = smov 0  }
  0x13 LB: > { %3497 = sst [smem:[#allocation11_spill]] %s2844_s29  ;;  %s2398_s21 = sadd.s32 4294967295, %s2872_s20   ;;  %s2872_s20 = sphi %s2978_s20, %s33_s20   ;;  %s2868_s19 = sphi %s2976_s19, %s3545_s19   ;;  %s2864_s18 = sphi %s2974_s18, %s3544_s18   ;;  %s2860_s17 = sphi %s2972_s17, %s3543_s17   ;;  %s2856_s16 = sphi %s2970_s16, %s3542_s16   ;;  %s2852_s15 = sphi %s2968_s15, %s3541_s15   ;;  %s2848_s30 = sphi %s2966_s30, %s3540_s30   ;;  %s2844_s29 = sphi %s2964_s29, %s3539_s29  }
  0x14   : > { %3498 = sst [smem:[#allocation12_spill]] %s2848_s30  ;;  %s2399_s22 = sadd.s32 4294967294, %s2872_s20  }
  0x15   : > { %3499 = sst [smem:[#allocation13_spill]] %s2852_s15  ;;  %s42_s23 = sadd.s32 1, %s2864_s18 }
  0x16   : > { %3500 = sst [smem:[#allocation14_spill]] %s2860_s17  ;;  %s45_s24 = sadd.s32 1, %s2868_s19 }
  0x17   : > { %3501 = sst [smem:[#allocation15_spill]] %s2864_s18  ;;  %p43_p0 = scmp.ge.s32.totalorder %s42_s23, 2 }
  0x18   : > { %3502 = sst [smem:[#allocation16_spill]] %s2868_s19  ;;  %s52_s25 = sadd.s32 1, %s2852_s15 }
  0x19   : > { %3503 = sst [smem:[#allocation17_spill]] %s2872_s20  ;;  %p59_p1 = scmp.ne.s32.totalorder %s2852_s15, %s2848_s30 }
  0x1a   : > { %p60_p2 = scmp.eq.s32.totalorder %s2872_s20, 0  ;;  %s3547_s23 = smov (%p43_p0, %s42_s23), 0 }
  0x1b   : > { %3504 = sst [smem:[#allocation18_spill]] %s3547_s23  ;;  %s3549_s24 = smov (!%p43_p0, %s45_s24), %s2868_s19 }
  0x1c   : > { %p3015_p3 = por %p60_p2, %p59_p1  ;;  %p65_p4 = scmp.ne.s32.totalorder %s2848_s30, %s2844_s29 }
  0x1d   : > { %p47_p5 = scmp.ge.s32.totalorder %s3549_s24, 2  ;;  %p66_p6 = scmp.eq.s32.totalorder %s2398_s21, 0 }
  0x1e   : > { %p427_p7 = scmp.eq.s32.totalorder %s2398_s21, 3  ;;  %p433_p8 = scmp.eq.s32.totalorder %s2399_s22, 3 }
  0x1f   : > { %s3551_s24 = smov (%p47_p5, %s3549_s24), 0  ;;  %p3023_p9 = por %p66_p6, %p65_p4 }
  0x20   : > { %3506 = sst [smem:[#allocation19_spill]] %s3551_s24  ;;  %p3027_p10 = por %p427_p7, %p59_p1 }
  0x21   : > { %s49_s23 = ssub.s32 %s2868_s19, %s3551_s24  ;;  %p3033_p11 = por %p433_p8, %p65_p4 }
  0x22   : > { %s3508_s28 = scalar_select %p3027_p10, 1, 0 }
  0x23   : > { %s3510_s18 = scalar_select %p3033_p11, 1, 0 }
  0x24   : > { %3509 = sst [smem:[#allocation20_spill]] %s3508_s28  ;;  %p50_p12 = scmp.eq.s32.totalorder %s49_s23, 0 }
  0x25   : > { %3511 = sst [smem:[#allocation21_spill]] %s3510_s18  ;;  %p2608_p13 = scmp.lt.s32.totalorder %s2872_s20, 4 }
  0x26   : > { %s3039_s21 = sand.u32 1, %s2852_s15   ;;  %s2403_s14 = sshll.u32 %s2868_s19, 7 }
  0x27   : > { %s3042_s22 = scalar_select %p50_p12, %s2852_s15, %s52_s25  }
  0x28   : > { %s2402_s29 = sshll.u32 %s3039_s21, 3  ;;  %s3513_s0 = sld [smem:[#allocation24_spill]] }
  0x29   : > { %3512 = sst [smem:[#allocation22_spill]] %s3042_s22  ;;  %s457_s28 = scalar_lea.vmem [#allocation2], %s2402_s29 }
  0x2a   : > { %s464_s24 = sshll.u32 %s457_s28, 4  ;;  %p3051_p0 = pnand %p2608_p13, %p3015_p3  ;;  %s465_s24 = int_to_ptr.vmem [resolvable:$true] %s464_s24 }
  0x2b   : > { %p2406_p1 = scmp.ge.s32.totalorder %s2872_s20, 1  ;;  %p567_p2 = scmp.lt.s32.totalorder %s2872_s20, 5 }
  0x2c   : > { %s454_s23 = scalar_lea.sflag [#allocation3], %s3039_s21  ;;  %p2718_p4 = pneg %p3051_p0 }
  0x2d   : > { %s2729_s25 = scalar_lea.vmem %s465_s24, 128  ;;  %s2874_s13 = smov [#allocation2]  }
  0x2e   : > { %s462_s12 = scalar_lea.hbm %s3513_s0, %s2403_s14  ;;  %p2730_p5 = scmp.ne.s32.totalorder %s465_s24, %s2729_s25 }
  0x2f   : > { %s2734_s17 = sshll.u32 %s2874_s13, 4  ;;  %s2735_s17 = int_to_ptr.vmem [resolvable:$false] %s2734_s17 }
  0x30   : > { %p2732_p6 = pnand %p2730_p5, %p2718_p4  ;;  %s2736_s26 = scalar_lea.vmem %s2735_s17, 256 }
  0x31   : > { %p2737_p3 = scmp.lt.s32.totalorder %s465_s24, %s2735_s17  ;;  %p2738_p8 = scmp.lt.s32.totalorder %s2736_s26, %s2729_s25 }
  0x32   : > { %p2733_p7 = pneg %p2732_p6 }
  0x33   : > { %p2739_p12 = por %p2738_p8, %p2737_p3 }
  0x35   : > { %p2740_p13 = pnand %p2739_p12, %p2733_p7 }
  0x37   : > { %2743 = shalt.err (!%p2740_p13)
}
  0x38   : > { %2600 = dma.hbm_to_vmem [thread:$0]  (!%p3051_p0), %s462_s12, 128, %s465_s24, %s454_s23  }
  0x39   : > { %p3069_p5 = pnand %p2406_p1, %p567_p2  ;;  %s3516_s1 = sld [smem:[#allocation25_spill]] }
  0x3a   : > { %s475_s17 = scalar_lea.vmem [#allocation5], %s2402_s29  ;;  %s472_s19 = scalar_lea.sflag [#allocation6], %s3039_s21 }
  0x3b   : > { %s482_s26 = sshll.u32 %s475_s17, 4  ;;  %s2875_s12 = smov [#allocation5]   ;;  %s483_s26 = int_to_ptr.vmem [resolvable:$true] %s482_s26 }
  0x3c   : > { %s2757_s22 = scalar_lea.vmem %s483_s26, 128  ;;  %s2762_s24 = sshll.u32 %s2875_s12, 4  ;;  %s2763_s24 = int_to_ptr.vmem [resolvable:$false] %s2762_s24 }
  0x3d   : > { %p2758_p6 = scmp.ne.s32.totalorder %s483_s26, %s2757_s22  ;;  %s2764_s23 = scalar_lea.vmem %s2763_s24, 256 }
  0x3e   : > { %p2765_p1 = scmp.lt.s32.totalorder %s483_s26, %s2763_s24  ;;  %p2766_p2 = scmp.lt.s32.totalorder %s2764_s23, %s2757_s22 }
  0x3f   : > { %s480_s25 = scalar_lea.hbm %s3516_s1, %s2403_s14  ;;  %p2760_p7 = pnand %p2758_p6, %p2718_p4 }
  0x40   : > { %p2767_p8 = por %p2766_p2, %p2765_p1 }
  0x41   : > { %p2761_p3 = pneg %p2760_p7 }
  0x43   : > { %p2768_p12 = pnand %p2767_p8, %p2761_p3 }
  0x45   : > { %2771 = shalt.err (!%p2768_p12)
}
  0x46   : > { %2603 = dma.hbm_to_vmem [thread:$0]  (!%p3051_p0), %s480_s25, 128, %s483_s26, %s472_s19  }
  0x47   : > { %571 = sbr.rel (%p3069_p5) target bundleno = 2689 (0xa81), region = 76 }
  0x4c   : > { %s3085_s0 = sand.u32 1, %s2848_s30  }
  0x4d   : > { %3517 = sst [smem:[#allocation23_spill]] %s3085_s0  ;;  %s3088_s14 = sshll.u32 %s3085_s0, 3 }
  0x4e   : > { %s574_s29 = scalar_lea.sflag [#allocation3], %s3085_s0  ;;  %s577_s21 = scalar_lea.vmem [#allocation2], %s3088_s14 }
  0x4f   : > { %2831 = dma.done.wait (%p3023_p9), %s574_s29, 128  }
  0x50   : > { %2833 = vsyncadd (%p3023_p9), %s574_s29, 4294967168  ;;  %s583_s18 = scalar_lea.sflag [#allocation6], %s3085_s0 }
  0x51   : > { %2835 = dma.done.wait (%p3023_p9), %s583_s18, 128  }
  0x52   : > { %2837 = vsyncadd (%p3023_p9), %s583_s18, 4294967168  ;;  %p680_p0 = scmp.lt.s32.totalorder %s2856_s16, 1  ;;  %s3518_s2 = sld [smem:[#allocation26_spill]] }
  0x53   : > { %s3519_s4 = sld [smem:[#allocation27_spill]]  ;;  %s3159_s24 = scalar_lea.vmem [#allocation7], %s3088_s14 }
  0x54   : > { %s3104_s22 = scalar_select %p680_p0, %s2856_s16, 1 }
  0x55   : > { %s3521_s8 = sld [smem:[#allocation29_spill]]  ;;  %p2418_p9 = scmp.ne.s32.totalorder %s2856_s16, 0 }
  0x56   : > { %s2462_s28 = sshll.u32 %s3104_s22, 4  ;;  %s717_s0 = scalar_lea.vmem %s3471_s11, %s3104_s22 }
  0x57   : > { %s3522_s20 = sld [smem:[#allocation30_spill]] }
  0x58   : > { %s684_s12 = scalar_lea.vmem %s3518_s2, %s2462_s28  ;;  %s709_s2 = scalar_lea.vmem %s3469_s9, %s3104_s22 }
  0x59   : > { %s3117_s29 = scalar_lea.vmem %s3519_s4, %s2462_s28  ;;  %s2465_s4 = sshll.u32 %s3104_s22, 5 }
  0x5a   : > { %s3144_s1 = scalar_lea.vmem %s3470_s10, %s2465_s4 }
  0x5b   : > { %s3134_s26 = scalar_lea.vmem %s3521_s8, %s2462_s28  ;;  %s3523_s8 = sld [smem:[#allocation31_spill]] }
  0x5d   : > { %s720_s25 = scalar_lea.vmem %s3522_s20, %s3104_s22  ;;  %728 = sbr.rel (%p2418_p9) target bundleno = 100 (0x64), region = 88 }
  0x61   : > { %s723_s7 = scalar_lea.vmem %s3523_s8, %s3104_s22 }
  0x62   : > { %v729_v0 = vld [vmem:[%s577_s21] sm:$0xff]  ;;  %vm730_vm0 = vcmask 261120  }
  0x63   : > { %731 = vst.msk [vmem:[%s3159_s24] sm:$0xff] %vm730_vm0, %v729_v0 }
  0x64 PF: > { %v2686_v1 = vld [vmem:[%s684_s12 + $0x8] sm:$0xff]   ;;  %v2876_v2 = vmov 0.0   ;;  %v2687_v3 = vld [vmem:[%s684_s12] sm:$0xff]   ;;  %vm2877_vm1 = vmmov 0   ;;  %s3524_s4 = scalar_lea.vmem [#allocation5], %s3088_s14  ;;  %vm760_vm2 = vcmask 261120   ;;  %s3525_s20 = scalar_lea.vmem %s3463_s3, %s3104_s22  ;;  %v871_v16 = vlaneseq }
  0x65   : > { %2499 = vmatprep.subr.bf16.mxu1 %v2876_v2  ;;  %2515 = vmatprep.subr.bf16.mxu0 %v2876_v2  ;;  %v733_v5 = vld [vmem:[%s3524_s4] sm:$0xff]  ;;  %v3185_v8 = vld [vmem:[%s3525_s20] ss:$0 sm:$0xff]  ;;  %s2878_s14 = smov 104   ;;  %s2879_s21 = smov 120   ;;  %vm1308_vm3 = vcmask 64512  }
  0x66   : > { %2500 = vmatpush3.bf16.msra.mxu1 %v2686_v1  ;;  %2503 = vmatprep.mubr.msk.bf16.mxu1 %vm2877_vm1, %v2876_v2  ;;  %s2880_s12 = smov 96   ;;  %s2881_s27 = smov 112   ;;  %v2882_v14 = vmov 1983009808   ;;  %v2883_v17 = vmov 1934713408  }
  0x67   : > { %2501 = vmatprep.subr.bf16.mxu1 %v2876_v2  ;;  %2517 = vmatprep.mubr.msk.bf16.mxu0 %vm2877_vm1, %v2876_v2  ;;  %v869_v15 = vunpack.c.l.s4 %v2882_v14  ;;  %v901_v18 = vunpack.c.l.s4 %v2883_v17  ;;  %v872_v20 = vshrl.u32 %v871_v16, 7  ;;  %s2884_s23 = smov 64   ;;  %vm1544_vm4 = vcmask 1043456   ;;  %s2886_s19 = smov 8  }
  0x68   : > { %s2887_s18 = smov 24   ;;  %vm1875_vm5 = vcmask 130048   ;;  %vm1877_vm6 = vcmask 195584   ;;  %s3526_s13 = scalar_lea.vmem %s3465_s5, %s3104_s22  ;;  %vm2085_vm7 = vcmask 523264  }
  0x69   : > { %v870_v19 = vunpack.c.0.s8 %v869_v15  ;;  %v902_v25 = vunpack.c.0.s8 %v901_v18  ;;  %s3527_s17 = scalar_lea.vmem %s3466_s6, %s3104_s22  ;;  %s3528_s16 = sld [smem:[#allocation28_spill]] }
  0x6a   : > { %v3168_v4 = vld [vmem:[%s3159_s24] sm:$0xff]  ;;  %2502 = vmatpush3.bf16.msra.mxu1 %v2687_v3  ;;  %s3535_s4 = sld [smem:[#allocation32_spill]] }
  0x6b   : > { %v739_v6 = vadd.f32 %v733_v5, %v3168_v4  ;;  %2507 = vmatprep.subr.bf16.mxu1 %v2876_v2  ;;  %v3191_v26 = vsub.s32 %v870_v19, %v872_v20  ;;  %v3193_v30 = vsub.s32 %v902_v25, %v872_v20 }
  0x6d   : > { %v740_v7 = vpack.c.bf16 %v739_v6, %v739_v6 }
  0x6f   : > { %2504 = vmatmul.mubr.msk.bf16.vlgmr.msra.gmra.mxu1 %vm760_vm2, %v740_v7  ;;  %s3529_s20 = scalar_lea.vmem %s3528_s16, %s3104_s22 }
  0x70   : > { %2511 = vmatprep.mubr.msk.bf16.mxu1 %vm2877_vm1, %v2876_v2 }
 0x12f   : > { %v798_v9 = vpop.f32.mrf.mxu1 }
 0x130   : > { %v799_v10 = vadd.f32 %v3185_v8, %v798_v9 }
 0x131   : > { %v2505_v11 = vpop.f32.mrf.mxu1 }
 0x132   : > { %863 = vrot.lane.b32.xlu1 %v799_v10, %s2878_s14  ;;  %857 = vrot.lane.b32.xlu0 %v799_v10, %s2879_s21 }
 0x133   : > { %v801_v12 = vpop.f32.mrf.mxu1 }
 0x135   : > { %v2506_v13 = vpop.f32.mrf.mxu1 }
 0x136   : > { %1006 = vrot.lane.b32.xlu1 %v799_v10, %s2880_s12  ;;  %860 = vrot.lane.b32.xlu0 %v799_v10, %s2881_s27 }
 0x1a4   : > { %v864_v21 = vpop.permute.xlu1 %863  ;;  %v858_v22 = vpop.permute.xlu0 %857 }
 0x1a5   : > { %v882_v23 = vcombine.low %v858_v22, %v864_v21  ;;  %v883_v24 = vcombine.high %v858_v22, %v864_v21  ;;  %1008 = vrot.lane.b32.xlu0 %v858_v22, %s2880_s12 }
 0x1a7   : > { %v890_v31 = vrot.slane %v882_v23, %v3191_v26  ;;  %v897_v32 = vrot.slane %v883_v24, %v3191_v26  ;;  %v741_v24 = vpack.c.bf16 %v3168_v4, %v3168_v4 }
 0x1a8   : > { %v861_v27 = vpop.permute.xlu0 %860  ;;  %v1007_v63 = vpop.permute.xlu1 %1006 }
 0x1a9   : > { %v866_v28 = vcombine.low %v799_v10, %v861_v27  ;;  %v867_v29 = vcombine.high %v799_v10, %v861_v27  ;;  %1012 = vrot.lane.b32.xlu0 %v864_v21, %s2880_s12  ;;  %1010 = vrot.lane.b32.xlu1 %v861_v27, %s2880_s12 }
 0x1ab   : > { %v874_v33 = vrot.slane %v866_v28, %v3191_v26  ;;  %v881_v34 = vrot.slane %v867_v29, %v3191_v26 }
 0x1ad   : > { %v898_v35 = vcombine.low %v874_v33, %v890_v31  ;;  %v899_v36 = vcombine.high %v874_v33, %v890_v31  ;;  %v914_v37 = vcombine.low %v881_v34, %v897_v32  ;;  %v915_v38 = vcombine.high %v881_v34, %v897_v32  ;;  %806 = vrot.lane.b32.xlu1 %v2686_v1, %s2884_s23 }
 0x1ae   : > { %804 = vrot.lane.b32.xlu0 %v2687_v3, %s2884_s23 }
 0x1af   : > { %v906_v39 = vrot.slane %v898_v35, %v3193_v30  ;;  %v913_v40 = vrot.slane %v899_v36, %v3193_v30  ;;  %v922_v41 = vrot.slane %v914_v37, %v3193_v30  ;;  %v929_v42 = vrot.slane %v915_v38, %v3193_v30 }
 0x1b1   : > { %v934_v43 = vcombine.low %v906_v39, %v913_v40  ;;  %v2424_v44 = vcombine.high %v906_v39, %v913_v40  ;;  %v950_v45 = vcombine.low %v922_v41, %v929_v42  ;;  %v2425_v46 = vcombine.high %v922_v41, %v929_v42 }
 0x1b3   : > { %v941_v47 = vrot.slane %v934_v43, %v3191_v26  ;;  %v949_v48 = vrot.slane %v2424_v44, %v3191_v26  ;;  %v957_v49 = vrot.slane %v950_v45, %v3191_v26  ;;  %v965_v50 = vrot.slane %v2425_v46, %v3191_v26 }
 0x1b5   : > { %v967_v51 = vcombine.high %v941_v47, %v949_v48  ;;  %v983_v52 = vcombine.high %v957_v49, %v965_v50  ;;  %v966_v53 = vcombine.low %v941_v47, %v949_v48  ;;  %v982_v54 = vcombine.low %v957_v49, %v965_v50 }
 0x1b7   : > { %v974_v55 = vrot.slane %v966_v53, %v3193_v30  ;;  %v990_v56 = vrot.slane %v982_v54, %v3193_v30  ;;  %v981_v57 = vrot.slane %v967_v51, %v3193_v30  ;;  %v997_v58 = vrot.slane %v983_v52, %v3193_v30 }
 0x1b9   : > { %v3213_v59 = vcombine.low %v974_v55, %v990_v56  ;;  %v3215_v60 = vcombine.high %v974_v55, %v990_v56  ;;  %v3217_v61 = vcombine.low %v981_v57, %v997_v58  ;;  %v3219_v62 = vcombine.high %v981_v57, %v997_v58 }
 0x1bb   : > { %v1002_v53 = vpack.c.bf16 %v3213_v59, %v3213_v59  ;;  %v1003_v54 = vpack.c.bf16 %v3215_v60, %v3215_v60  ;;  %v1004_v57 = vpack.c.bf16 %v3217_v61, %v3217_v61  ;;  %v1005_v58 = vpack.c.bf16 %v3219_v62, %v3219_v62 }
 0x217   : > { %v1009_v0 = vpop.permute.xlu0 %1008 }
 0x21b   : > { %v1011_v1 = vpop.permute.xlu1 %1010  ;;  %v1013_v3 = vpop.permute.xlu0 %1012 }
 0x21c   : > { %v1018_v5 = vcombine.low %v1007_v63, %v1011_v1  ;;  %v1019_v6 = vcombine.high %v1007_v63, %v1011_v1  ;;  %v1034_v7 = vcombine.low %v1009_v0, %v1013_v3  ;;  %v1035_v9 = vcombine.high %v1009_v0, %v1013_v3 }
 0x21e   : > { %v1026_v10 = vrot.slane %v1018_v5, %v3191_v26  ;;  %v1033_v11 = vrot.slane %v1019_v6, %v3191_v26  ;;  %v1042_v12 = vrot.slane %v1034_v7, %v3191_v26  ;;  %v1049_v13 = vrot.slane %v1035_v9, %v3191_v26 }
 0x21f   : > { %v807_v14 = vpop.permute.xlu1 %806 }
 0x220   : > { %v1050_v15 = vcombine.low %v1026_v10, %v1042_v12  ;;  %v1051_v16 = vcombine.high %v1026_v10, %v1042_v12  ;;  %v1066_v17 = vcombine.low %v1033_v11, %v1049_v13  ;;  %v1067_v18 = vcombine.high %v1033_v11, %v1049_v13  ;;  %2508 = vmatpush3.bf16.msra.mxu1 %v807_v14  ;;  %v805_v19 = vpop.permute.xlu0 %804 }
 0x221   : > { %2509 = vmatprep.subr.bf16.mxu1 %v2876_v2 }
 0x222   : > { %v1058_v20 = vrot.slane %v1050_v15, %v3193_v30  ;;  %v1065_v21 = vrot.slane %v1051_v16, %v3193_v30  ;;  %v1074_v22 = vrot.slane %v1066_v17, %v3193_v30  ;;  %v1081_v23 = vrot.slane %v1067_v18, %v3193_v30 }
 0x224   : > { %v1086_v25 = vcombine.low %v1058_v20, %v1065_v21  ;;  %v2426_v27 = vcombine.high %v1058_v20, %v1065_v21  ;;  %v1102_v28 = vcombine.low %v1074_v22, %v1081_v23  ;;  %v2427_v29 = vcombine.high %v1074_v22, %v1081_v23  ;;  %2510 = vmatpush3.bf16.msra.mxu1 %v805_v19 }
 0x225   : > { %2521 = vmatprep.subr.bf16.mxu1 %v2876_v2 }
 0x226   : > { %v1093_v31 = vrot.slane %v1086_v25, %v3191_v26  ;;  %v1101_v32 = vrot.slane %v2426_v27, %v3191_v26  ;;  %v1109_v33 = vrot.slane %v1102_v28, %v3191_v26  ;;  %v1117_v34 = vrot.slane %v2427_v29, %v3191_v26 }
 0x227   : > { %2512 = vmatmul.mubr.msk.bf16.vlgmr.msra.gmra.mxu1 %vm760_vm2, %v741_v24 }
 0x228   : > { %v1118_v35 = vcombine.low %v1093_v31, %v1101_v32  ;;  %v1134_v36 = vcombine.low %v1109_v33, %v1117_v34  ;;  %2523 = vmatprep.mubr.msk.bf16.mxu1 %vm2877_vm1, %v2876_v2  ;;  %v1119_v37 = vcombine.high %v1093_v31, %v1101_v32  ;;  %v1135_v38 = vcombine.high %v1109_v33, %v1117_v34 }
 0x22a   : > { %v1126_v39 = vrot.slane %v1118_v35, %v3193_v30  ;;  %v1142_v40 = vrot.slane %v1134_v36, %v3193_v30  ;;  %v1133_v43 = vrot.slane %v1119_v37, %v3193_v30  ;;  %v1149_v44 = vrot.slane %v1135_v38, %v3193_v30 }
 0x22c   : > { %v1150_v41 = vcombine.low %v1126_v39, %v1142_v40  ;;  %v1151_v42 = vcombine.high %v1126_v39, %v1142_v40  ;;  %v1152_v49 = vcombine.low %v1133_v43, %v1149_v44  ;;  %v1153_v50 = vcombine.high %v1133_v43, %v1149_v44 }
 0x22e   : > { %v1154_v45 = vpack.c.bf16 %v1150_v41, %v1150_v41  ;;  %v1155_v46 = vpack.c.bf16 %v1151_v42, %v1151_v42  ;;  %v1156_v51 = vpack.c.bf16 %v1152_v49, %v1152_v49  ;;  %v1157_v52 = vpack.c.bf16 %v1153_v50, %v1153_v50 }
 0x230   : > { %v1313_v47 = vsel %vm1308_vm3, %v1154_v45, 0  ;;  %v1359_v48 = vsel %vm1308_vm3, %v1155_v46, 0  ;;  %v1405_v55 = vsel %vm1308_vm3, %v1156_v51, 0  ;;  %v1451_v56 = vsel %vm1308_vm3, %v1157_v52, 0 }
 0x231   : > { %2516 = vmatpush3.bf16.xpose.msra.mxu0 %v1313_v47  ;;  %2522 = vmatpush3.bf16.xpose.msra.mxu1 %v1359_v48 }
 0x232   : > { %2527 = vmatprep.subr.bf16.mxu0 %v2876_v2  ;;  %2533 = vmatprep.subr.bf16.mxu1 %v2876_v2 }
 0x238   : > { %2518 = vmatmul.mubr.msk.bf16.vlgmr.msra.gmra.mxu0 %vm1308_vm3, %v1002_v53  ;;  %2524 = vmatmul.mubr.msk.bf16.vlgmr.msra.gmra.mxu1 %vm1308_vm3, %v1003_v54 }
 0x239   : > { %2528 = vmatpush3.bf16.xpose.msra.mxu0 %v1405_v55  ;;  %2534 = vmatpush3.bf16.xpose.msra.mxu1 %v1451_v56 }
 0x23a   : > { %2529 = vmatprep.mubr.msk.bf16.mxu0 %vm2877_vm1, %v2876_v2  ;;  %2535 = vmatprep.mubr.msk.bf16.mxu1 %vm2877_vm1, %v2876_v2 }
 0x23b   : > { %2539 = vmatprep.subr.bf16.mxu0 %v2876_v2  ;;  %2545 = vmatprep.subr.bf16.mxu1 %v2876_v2 }
 0x240   : > { %2530 = vmatmul.mubr.msk.bf16.vlgmr.msra.gmra.mxu0 %vm1308_vm3, %v1004_v57  ;;  %2536 = vmatmul.mubr.msk.bf16.vlgmr.msra.gmra.mxu1 %vm1308_vm3, %v1005_v58 }
 0x241   : > { %2541 = vmatprep.mubr.msk.bf16.mxu0 %vm2877_vm1, %v2876_v2  ;;  %2547 = vmatprep.mubr.msk.bf16.mxu1 %vm2877_vm1, %v2876_v2 }
 0x2e7   : > { %v850_v59 = vpop.f32.mrf.mxu1 }
 0x2e9   : > { %v2513_v60 = vpop.f32.mrf.mxu1 }
 0x2eb   : > { %v853_v63 = vpop.f32.mrf.mxu1 }
 0x2ed   : > { %v2514_v0 = vpop.f32.mrf.mxu1 }
 0x2f8   : > { %v1349_v1 = vpop.f32.mrf.mxu0  ;;  %v1395_v3 = vpop.f32.mrf.mxu1 }
 0x2f9   : > { %v1493_v61 = vsel %vm1308_vm3, %v1349_v1, -inf  ;;  %v1496_v62 = vsel %vm1308_vm3, %v1395_v3, -inf }
 0x2fa   : > { %1494 = vmax.xlane.f32.xlu1 %v1493_v61  ;;  %v2519_v5 = vpop.f32.mrf.mxu0  ;;  %1497 = vmax.xlane.f32.xlu0 %v1496_v62  ;;  %v2525_v6 = vpop.f32.mrf.mxu1 }
 0x2fc   : > { %v1352_v7 = vpop.f32.mrf.mxu0  ;;  %v1398_v9 = vpop.f32.mrf.mxu1 }
 0x2fe   : > { %v2520_v10 = vpop.f32.mrf.mxu0  ;;  %v2526_v11 = vpop.f32.mrf.mxu1 }
 0x300   : > { %v1441_v12 = vpop.f32.mrf.mxu0  ;;  %v1487_v13 = vpop.f32.mrf.mxu1 }
 0x301   : > { %v1499_v14 = vsel %vm1308_vm3, %v1441_v12, -inf  ;;  %v1502_v15 = vsel %vm1308_vm3, %v1487_v13, -inf }
 0x302   : > { %v2531_v16 = vpop.f32.mrf.mxu0  ;;  %1500 = vmax.xlane.f32.xlu0 %v1499_v14  ;;  %1503 = vmax.xlane.f32.xlu1 %v1502_v15  ;;  %v2537_v17 = vpop.f32.mrf.mxu1 }
 0x304   : > { %v1444_v18 = vpop.f32.mrf.mxu0  ;;  %v1490_v19 = vpop.f32.mrf.mxu1 }
 0x306   : > { %v2532_v20 = vpop.f32.mrf.mxu0  ;;  %v2538_v21 = vpop.f32.mrf.mxu1 }
 0x318   : > { %810 = vrot.lane.b32.xlu0 %v3185_v8, %s2884_s23 }
 0x383   : > { %v1495_v22 = vpop.xlane.xlu1 %1494  ;;  %v1498_v23 = vpop.xlane.xlu0 %1497 }
 0x384   : > { %v1505_v24 = vsub.f32 %v1349_v1, %v1495_v22  ;;  %v1506_v25 = vsub.f32 %v1395_v3, %v1498_v23 }
 0x386   : > { %v1509_v27 = vmul.f32 1.442695, %v1505_v24  ;;  %v1511_v28 = vmul.f32 1.442695, %v1506_v25 }
 0x388   : > { %2696 = vpow2.f32 %v1509_v27 }
 0x389   : > { %2698 = vpow2.f32 %v1511_v28 }
 0x38b   : > { %v1501_v29 = vpop.xlane.xlu0 %1500  ;;  %v1504_v35 = vpop.xlane.xlu1 %1503 }
 0x38c   : > { %v1508_v37 = vsub.f32 %v1487_v13, %v1504_v35  ;;  %v1507_v41 = vsub.f32 %v1441_v12, %v1501_v29 }
 0x38e   : > { %v1515_v38 = vmul.f32 1.442695, %v1508_v37  ;;  %v1513_v42 = vmul.f32 1.442695, %v1507_v41 }
 0x38f   : > { %v811_v31 = vpop.permute.xlu0 %810 }
 0x390   : > { %v851_v32 = vadd.f32 %v850_v59, %v811_v31  ;;  %2700 = vpow2.f32 %v1515_v38 }
 0x391   : > { %2702 = vpow2.f32 %v1513_v42 }
 0x392   : > { %1162 = vrot.lane.b32.xlu0 %v851_v32, %s2881_s27 }
 0x395   : > { %v3279_v33 = vpop.eup %2696 }
 0x396   : > { %1165 = vrot.lane.b32.xlu0 %v851_v32, %s2878_s14  ;;  %v1517_v8 = vsel %vm1308_vm3, %v3279_v33, 0.0  ;;  %v3284_v34 = vpop.eup %2698 }
 0x397   : > { %1518 = vadd.xlane.f32.xlu1 %v1517_v8  ;;  %v1520_v36 = vsel %vm1308_vm3, %v3284_v34, 0.0 }
 0x39b   : > { %1521 = vadd.xlane.f32.xlu1 %v1520_v36 }
 0x39d   : > { %v3289_v39 = vpop.eup %2700 }
 0x39e   : > { %v1526_v40 = vsel %vm1308_vm3, %v3289_v39, 0.0  ;;  %v3293_v43 = vpop.eup %2702 }
 0x39f   : > { %v1523_v44 = vsel %vm1308_vm3, %v3293_v43, 0.0 }
 0x3ac   : > { %1159 = vrot.lane.b32.xlu1 %v851_v32, %s2879_s21 }
 0x3b5   : > { %1527 = vadd.xlane.f32.xlu0 %v1526_v40 }
 0x3d0   : > { %1524 = vadd.xlane.f32.xlu1 %v1523_v44 }
 0x404   : > { %v1163_v46 = vpop.permute.xlu0 %1162 }
 0x405   : > { %v1168_v48 = vcombine.low %v851_v32, %v1163_v46  ;;  %v1169_v49 = vcombine.high %v851_v32, %v1163_v46 }
 0x407   : > { %v1176_v54 = vrot.slane %v1168_v48, %v3191_v26  ;;  %v1183_v55 = vrot.slane %v1169_v49, %v3191_v26 }
 0x408   : > { %v1166_v50 = vpop.permute.xlu0 %1165 }
 0x420   : > { %v1519_v45 = vpop.xlane.xlu1 %1518 }
 0x421   : > { %2704 = vrcp.f32 %v1519_v45 }
 0x424   : > { %v1522_v47 = vpop.xlane.xlu1 %1521 }
 0x425   : > { %2706 = vrcp.f32 %v1522_v47 }
 0x428   : > { %v1160_v51 = vpop.permute.xlu1 %1159 }
 0x429   : > { %v1184_v52 = vcombine.low %v1160_v51, %v1166_v50  ;;  %v1185_v53 = vcombine.high %v1160_v51, %v1166_v50  ;;  %v2688_v50 = vld [vmem:[%s3117_s29 + $0x8] sm:$0xff]  }
 0x42b   : > { %v1192_v56 = vrot.slane %v1184_v52, %v3191_v26  ;;  %v1199_v57 = vrot.slane %v1185_v53, %v3191_v26 }
 0x42d   : > { %v1200_v58 = vcombine.low %v1176_v54, %v1192_v56  ;;  %v1201_v59 = vcombine.high %v1176_v54, %v1192_v56  ;;  %v1216_v60 = vcombine.low %v1183_v55, %v1199_v57  ;;  %v1217_v63 = vcombine.high %v1183_v55, %v1199_v57 }
 0x42e   : > { %v2705_v17 = vpop.eup %2704 }
 0x42f   : > { %v1208_v0 = vrot.slane %v1200_v58, %v3193_v30  ;;  %v1215_v1 = vrot.slane %v1201_v59, %v3193_v30  ;;  %v1224_v3 = vrot.slane %v1216_v60, %v3193_v30  ;;  %v1231_v61 = vrot.slane %v1217_v63, %v3193_v30 }
 0x430   : > { %v1533_v31 = vmul.f32 %v2705_v17, %v3279_v33 }
 0x431   : > { %v1236_v62 = vcombine.low %v1208_v0, %v1215_v1  ;;  %v2428_v5 = vcombine.high %v1208_v0, %v1215_v1  ;;  %v1252_v6 = vcombine.low %v1224_v3, %v1231_v61  ;;  %v2429_v7 = vcombine.high %v1224_v3, %v1231_v61 }
 0x432   : > { %v2707_v22 = vpop.eup %2706  ;;  %v1537_v40 = vpack.c.bf16 %v1533_v31, %v1533_v31 }
 0x433   : > { %v1243_v9 = vrot.slane %v1236_v62, %v3191_v26  ;;  %v1251_v10 = vrot.slane %v2428_v5, %v3191_v26  ;;  %v1259_v11 = vrot.slane %v1252_v6, %v3191_v26  ;;  %v1267_v12 = vrot.slane %v2429_v7, %v3191_v26 }
 0x434   : > { %v1534_v32 = vmul.f32 %v2707_v22, %v3284_v34 }
 0x435   : > { %v1268_v13 = vcombine.low %v1243_v9, %v1251_v10  ;;  %v1284_v14 = vcombine.low %v1259_v11, %v1267_v12  ;;  %v1269_v15 = vcombine.high %v1243_v9, %v1251_v10  ;;  %v1285_v16 = vcombine.high %v1259_v11, %v1267_v12 }
 0x436   : > { %v1538_v41 = vpack.c.bf16 %v1534_v32, %v1534_v32 }
 0x437   : > { %v1276_v18 = vrot.slane %v1268_v13, %v3193_v30  ;;  %v1292_v19 = vrot.slane %v1284_v14, %v3193_v30  ;;  %v1283_v20 = vrot.slane %v1269_v15, %v3193_v30  ;;  %v1299_v21 = vrot.slane %v1285_v16, %v3193_v30  ;;  %v2689_v16 = vld [vmem:[%s3117_s29] sm:$0xff]   ;;  %s2885_s29 = smov 16  }
 0x439   : > { %v1300_v23 = vcombine.low %v1276_v18, %v1292_v19  ;;  %v1301_v24 = vcombine.high %v1276_v18, %v1292_v19  ;;  %v1302_v25 = vcombine.low %v1283_v20, %v1299_v21  ;;  %v1303_v27 = vcombine.high %v1283_v20, %v1299_v21 }
 0x43b   : > { %v1304_v28 = vpack.c.bf16 %v1300_v23, %v1300_v23  ;;  %v1305_v29 = vpack.c.bf16 %v1301_v24, %v1301_v24  ;;  %v1306_v36 = vpack.c.bf16 %v1302_v25, %v1302_v25  ;;  %v1307_v37 = vpack.c.bf16 %v1303_v27, %v1303_v27 }
 0x43d   : > { %v1546_v8 = vsel %vm1544_vm4, %v1304_v28, 0  ;;  %v1592_v35 = vsel %vm1544_vm4, %v1305_v29, 0  ;;  %v1638_v33 = vsel %vm1544_vm4, %v1306_v36, 0  ;;  %v1684_v34 = vsel %vm1544_vm4, %v1307_v37, 0 }
 0x43e   : > { %v1528_v38 = vpop.xlane.xlu0 %1527  ;;  %2540 = vmatpush3.bf16.msra.mxu0 %v1546_v8  ;;  %2546 = vmatpush3.bf16.msra.mxu1 %v1592_v35 }
 0x43f   : > { %2708 = vrcp.f32 %v1528_v38  ;;  %2551 = vmatprep.subr.bf16.mxu0 %v2876_v2  ;;  %2557 = vmatprep.subr.bf16.mxu1 %v2876_v2 }
 0x441   : > { %2542 = vmatmul.mubr.msk.bf16.vlgmr.msra.gmra.mxu0 %vm1308_vm3, %v1537_v40  ;;  %2548 = vmatmul.mubr.msk.bf16.vlgmr.msra.gmra.mxu1 %vm1308_vm3, %v1538_v41 }
 0x442   : > { %2552 = vmatpush3.bf16.msra.mxu0 %v1638_v33  ;;  %2558 = vmatpush3.bf16.msra.mxu1 %v1684_v34 }
 0x443   : > { %2559 = vmatprep.mubr.msk.bf16.mxu1 %vm2877_vm1, %v2876_v2  ;;  %2553 = vmatprep.mubr.msk.bf16.mxu0 %vm2877_vm1, %v2876_v2 }
 0x444   : > { %2563 = vmatprep.subr.bf16.mxu0 %v2876_v2  ;;  %2571 = vmatprep.subr.bf16.mxu1 %v2876_v2 }
 0x44c   : > { %v2709_v42 = vpop.eup %2708 }
 0x44d   : > { %v1536_v44 = vmul.f32 %v2709_v42, %v3289_v39 }
 0x44f   : > { %v1540_v45 = vpack.c.bf16 %v1536_v44, %v1536_v44 }
 0x451   : > { %2560 = vmatmul.mubr.msk.bf16.vlgmr.msra.gmra.mxu1 %vm1308_vm3, %v1540_v45 }
 0x452   : > { %2575 = vmatprep.mubr.msk.bf16.mxu1 %vm2877_vm1, %v2876_v2 }
 0x459   : > { %v1525_v46 = vpop.xlane.xlu1 %1524 }
 0x45a   : > { %2710 = vrcp.f32 %v1525_v46 }
 0x467   : > { %v2711_v47 = vpop.eup %2710 }
 0x468   : > { %v1535_v48 = vmul.f32 %v2711_v47, %v3293_v43 }
 0x46a   : > { %v1539_v49 = vpack.c.bf16 %v1535_v48, %v1535_v48 }
 0x46c   : > { %2554 = vmatmul.mubr.msk.bf16.vlgmr.msra.gmra.mxu0 %vm1308_vm3, %v1539_v49  ;;  %v2440_v49 = vld [vmem:[%s3526_s13] ss:$0 sm:$0xff] }
 0x46d   : > { %2567 = vmatprep.mubr.msk.bf16.mxu0 %vm2877_vm1, %v2876_v2  ;;  %2564 = vmatpush3.bf16.msra.mxu0 %v2688_v50 }
 0x46e   : > { %2565 = vmatprep.subr.bf16.mxu0 %v2876_v2 }
 0x471   : > { %2566 = vmatpush3.bf16.msra.mxu0 %v2689_v16 }
 0x472   : > { %2579 = vmatprep.subr.bf16.mxu0 %v2876_v2 }
 0x501   : > { %v1582_v39 = vpop.f32.mrf.mxu0  ;;  %v1628_v51 = vpop.f32.mrf.mxu1 }
 0x503   : > { %v2543_v52 = vpop.f32.mrf.mxu0  ;;  %v2549_v53 = vpop.f32.mrf.mxu1 }
 0x505   : > { %v1585_v54 = vpop.f32.mrf.mxu0  ;;  %v1631_v55 = vpop.f32.mrf.mxu1 }
 0x507   : > { %v2544_v56 = vpop.f32.mrf.mxu0  ;;  %v2550_v57 = vpop.f32.mrf.mxu1 }
 0x511   : > { %v1720_v58 = vpop.f32.mrf.mxu1 }
 0x512   : > { %v1742_v63 = vcombine.low %v1628_v51, %v1720_v58  ;;  %v1743_v0 = vcombine.high %v1628_v51, %v1720_v58 }
 0x513   : > { %v2561_v43 = vpop.f32.mrf.mxu1 }
 0x514   : > { %v1750_v5 = vrot.slane %v1742_v63, %v3191_v26  ;;  %v1757_v6 = vrot.slane %v1743_v0, %v3191_v26  ;;  %v2691_v63 = vld [vmem:[%s3134_s26] sm:$0xff]   ;;  %v2693_v0 = vld [vmem:[%s3144_s1 + $0x10] sm:$0xff]  }
 0x515   : > { %v1723_v59 = vpop.f32.mrf.mxu1 }
 0x517   : > { %v2562_v60 = vpop.f32.mrf.mxu1 }
 0x518   : > { %v2690_v60 = vld [vmem:[%s3134_s26 + $0x8] sm:$0xff]   ;;  %s2174_s26 = sshll.u32 %s3159_s24, 4  ;;  %s2175_s26 = int_to_ptr.vmem [resolvable:$true] %s2174_s26 }
 0x519   : > { %2572 = vmatpush3.bf16.msra.mxu1 %v2690_v60 }
 0x51a   : > { %2573 = vmatprep.subr.bf16.mxu1 %v2876_v2 }
 0x51d   : > { %2574 = vmatpush3.bf16.msra.mxu1 %v2691_v63 }
 0x52c   : > { %v1674_v1 = vpop.f32.mrf.mxu0 }
 0x52d   : > { %v1726_v3 = vcombine.low %v1582_v39, %v1674_v1  ;;  %v1727_v61 = vcombine.high %v1582_v39, %v1674_v1 }
 0x52e   : > { %v2555_v62 = vpop.f32.mrf.mxu0 }
 0x52f   : > { %v1734_v7 = vrot.slane %v1726_v3, %v3191_v26  ;;  %v1741_v9 = vrot.slane %v1727_v61, %v3191_v26 }
 0x530   : > { %v1677_v10 = vpop.f32.mrf.mxu0 }
 0x531   : > { %v1758_v11 = vcombine.low %v1734_v7, %v1750_v5  ;;  %v1759_v12 = vcombine.high %v1734_v7, %v1750_v5  ;;  %v1774_v13 = vcombine.low %v1741_v9, %v1757_v6  ;;  %v1775_v14 = vcombine.high %v1741_v9, %v1757_v6  ;;  %v2444_v5 = vld [vmem:[%s3527_s17] ss:$0 sm:$0xff] }
 0x532   : > { %v2556_v15 = vpop.f32.mrf.mxu0  ;;  %v2445_v7 = vld [vmem:[%s3529_s20] ss:$0 sm:$0xff]  ;;  %s2772_s20 = scalar_lea.vmem %s2175_s26, 128 }
 0x533   : > { %v1766_v17 = vrot.slane %v1758_v11, %v3193_v30  ;;  %v1773_v18 = vrot.slane %v1759_v12, %v3193_v30  ;;  %v1782_v19 = vrot.slane %v1774_v13, %v3193_v30  ;;  %v1789_v20 = vrot.slane %v1775_v14, %v3193_v30  ;;  %v2694_v12 = vld [vmem:[%s3144_s1 + $0x8] sm:$0xff]   ;;  %v2695_v13 = vld [vmem:[%s3144_s1] sm:$0xff]   ;;  %p2773_p4 = scmp.ne.s32.totalorder %s2175_s26, %s2772_s20 }
 0x534   : > { %v2446_v14 = vld [vmem:[%s709_s2] ss:$0 sm:$0xff]  ;;  %s3531_s2 = sld [smem:[#allocation23_spill]] }
 0x535   : > { %v1794_v21 = vcombine.low %v1766_v17, %v1773_v18  ;;  %v2438_v22 = vcombine.high %v1766_v17, %v1773_v18  ;;  %v1810_v23 = vcombine.low %v1782_v19, %v1789_v20  ;;  %v2439_v24 = vcombine.high %v1782_v19, %v1789_v20  ;;  %p2774_p13 = pnand %p2773_p4, %p3027_p10 }
 0x537   : > { %v1801_v25 = vrot.slane %v1794_v21, %v3191_v26  ;;  %v1809_v27 = vrot.slane %v2438_v22, %v3191_v26  ;;  %v1817_v28 = vrot.slane %v1810_v23, %v3191_v26  ;;  %v1825_v29 = vrot.slane %v2439_v24, %v3191_v26  ;;  %p2775_p5 = pneg %p2774_p13 }
 0x539   : > { %v1827_v31 = vcombine.high %v1801_v25, %v1809_v27  ;;  %v1843_v32 = vcombine.high %v1817_v28, %v1825_v29  ;;  %v1826_v8 = vcombine.low %v1801_v25, %v1809_v27  ;;  %v1842_v35 = vcombine.low %v1817_v28, %v1825_v29 }
 0x53a   : > { %s2161_s16 = scalar_lea.sflag [#allocation4], %s3531_s2 }
 0x53b   : > { %v1841_v36 = vrot.slane %v1827_v31, %v3193_v30  ;;  %v1857_v37 = vrot.slane %v1843_v32, %v3193_v30  ;;  %v1834_v38 = vrot.slane %v1826_v8, %v3193_v30  ;;  %v1850_v40 = vrot.slane %v1842_v35, %v3193_v30 }
 0x53d   : > { %v1860_v41 = vcombine.low %v1841_v36, %v1857_v37  ;;  %v1859_v33 = vcombine.high %v1834_v38, %v1850_v40  ;;  %v1858_v34 = vcombine.low %v1834_v38, %v1850_v40  ;;  %v1861_v26 = vcombine.high %v1841_v36, %v1857_v37 }
 0x53f   : > { %1867 = vrot.lane.b32.xlu1 %v1860_v41, %s2885_s29  ;;  %1863 = vrot.lane.b32.xlu0 %v1859_v33, %s2886_s19  ;;  %v2456_v33 = vld [vmem:[%s720_s25] ss:$0 sm:$0xff]  ;;  %s2888_s25 = smov [#allocation7]  }
 0x540   : > { %s2776_s22 = sshll.u32 %s2888_s25, 4  ;;  %s2777_s22 = int_to_ptr.vmem [resolvable:$false] %s2776_s22 }
 0x541   : > { %p2779_p6 = scmp.lt.s32.totalorder %s2175_s26, %s2777_s22 }
 0x543   : > { %1871 = vrot.lane.b32.xlu1 %v1861_v26, %s2887_s18  ;;  %v2457_v26 = vld [vmem:[%s723_s7] ss:$0 sm:$0xff]  ;;  %s2778_s7 = scalar_lea.vmem %s2777_s22, 256 }
 0x544   : > { %p2780_p7 = scmp.lt.s32.totalorder %s2778_s7, %s2772_s20 }
 0x546   : > { %p2781_p3 = por %p2780_p7, %p2779_p6 }
 0x548   : > { %p2782_p1 = pnand %p2781_p3, %p2775_p5 }
 0x5b1   : > { %v1868_v42 = vpop.permute.xlu1 %1867  ;;  %v1864_v44 = vpop.permute.xlu0 %1863 }
 0x5b2   : > { %v1874_v45 = vsel %vm1308_vm3, %v1858_v34, %v1864_v44 }
 0x5b3   : > { %v1876_v47 = vsel %vm1875_vm5, %v1874_v45, %v1868_v42 }
 0x5b5   : > { %v1872_v46 = vpop.permute.xlu1 %1871 }
 0x5b6   : > { %v1878_v30 = vsel %vm1877_vm6, %v1876_v47, %v1872_v46 }
 0x5b7   : > { %v1879_v48 = vpack.c.bf16 %v1878_v30, %v1878_v30 }
 0x5b9   : > { %2568 = vmatmul.mubr.msk.bf16.vlgmr.msra.gmra.mxu0 %vm760_vm2, %v1879_v48 }
 0x5ba   : > { %2587 = vmatprep.mubr.msk.bf16.mxu0 %vm2877_vm1, %v2876_v2 }
 0x679   : > { %v1940_v50 = vpop.f32.mrf.mxu0 }
 0x67a   : > { %v1941_v39 = vadd.f32 %v2440_v49, %v1940_v50 }
 0x67b   : > { %v2569_v51 = vpop.f32.mrf.mxu0 }
 0x67c   : > { %v1946_v52 = vadd.f32 %v1941_v39, %v3168_v4  ;;  %v2692_v4 = vld [vmem:[%s3144_s1 + $0x18] sm:$0xff]   ;;  %s3530_s1 = sld [smem:[#allocation14_spill]] }
 0x67d   : > { %v1943_v53 = vpop.f32.mrf.mxu0  ;;  %2580 = vmatpush3.bf16.msra.mxu0 %v2692_v4 }
 0x67e   : > { %v1947_v54 = vsel %vm760_vm2, %v1946_v52, 0.0  ;;  %2581 = vmatprep.subr.bf16.mxu0 %v2876_v2 }
 0x67f   : > { %1948 = vadd.xlane.f32.xlu0 %v1947_v54  ;;  %v2570_v55 = vpop.f32.mrf.mxu0 }
 0x681   : > { %2582 = vmatpush3.bf16.msra.mxu0 %v2693_v0 }
 0x682   : > { %2583 = vmatprep.subr.bf16.mxu0 %v2876_v2  ;;  %s2459_s13 = sshll.u32 %s3530_s1, 7 }
 0x683   : > { %s2172_s8 = scalar_lea.hbm %s3535_s4, %s2459_s13 }
 0x685   : > { %2584 = vmatpush3.bf16.msra.mxu0 %v2694_v12 }
 0x686   : > { %2585 = vmatprep.subr.bf16.mxu0 %v2876_v2  ;;  %v2450_v2 = vld [vmem:[%s717_s0] ss:$0 sm:$0xff] }
 0x689   : > { %2586 = vmatpush3.bf16.msra.mxu0 %v2695_v13 }
 0x708   : > { %v1949_v56 = vpop.xlane.xlu0 %1948 }
 0x709   : > { %v1951_v57 = vmul.f32 0.03125, %v1949_v56 }
 0x70b   : > { %v1952_v58 = vsub.f32 %v1946_v52, %v1951_v57 }
 0x70d   : > { %v1953_v43 = vmul.f32 %v1952_v58, %v1952_v58 }
 0x70f   : > { %v1954_v59 = vsel %vm760_vm2, %v1953_v43, 0.0 }
 0x710   : > { %1955 = vadd.xlane.f32.xlu1 %v1954_v59 }
 0x799   : > { %v1956_v1 = vpop.xlane.xlu1 %1955 }
 0x79a   : > { %v1957_v3 = vmul.f32 0.03125, %v1956_v1 }
 0x79c   : > { %v1958_v61 = vadd.f32 1e-05, %v1957_v3 }
 0x79e   : > { %2712 = vrsqrt.f32 %v1958_v61 }
 0x7ab   : > { %v2713_v62 = vpop.eup %2712 }
 0x7ac   : > { %v1960_v6 = vmul.f32 %v2713_v62, %v1952_v58 }
 0x7ae   : > { %v1968_v9 = vmul.f32 %v2444_v5, %v1960_v6 }
 0x7b0   : > { %v1976_v10 = vadd.f32 %v2445_v7, %v1968_v9 }
 0x7b2   : > { %v1977_v11 = vpack.c.bf16 %v1976_v10, %v1976_v10 }
 0x7b4   : > { %2576 = vmatmul.mubr.msk.bf16.vlgmr.msra.gmra.mxu1 %vm760_vm2, %v1977_v11 }
 0x874   : > { %v2038_v15 = vpop.f32.mrf.mxu1 }
 0x875   : > { %v2039_v16 = vadd.f32 %v2446_v14, %v2038_v15 }
 0x876   : > { %v2577_v17 = vpop.f32.mrf.mxu1 }
 0x877   : > { %v2044_v18 = vmax.f32 %v2039_v16, 0.0 }
 0x878   : > { %v2041_v19 = vpop.f32.mrf.mxu1 }
 0x879   : > { %v2045_v20 = vpack.c.bf16 %v2044_v18, %v2044_v18 }
 0x87a   : > { %v2578_v21 = vpop.f32.mrf.mxu1 }
 0x87b   : > { %2588 = vmatmul.mubr.msk.bf16.vlgmr.msra.gmra.mxu0 %vm2085_vm7, %v2045_v20 }
 0x93b   : > { %v2123_v22 = vpop.f32.mrf.mxu0 }
 0x93c   : > { %v2124_v23 = vadd.f32 %v2450_v2, %v2123_v22 }
 0x93d   : > { %v2589_v24 = vpop.f32.mrf.mxu0 }
 0x93e   : > { %v2129_v25 = vadd.f32 %v2124_v23, %v1976_v10 }
 0x93f   : > { %v2126_v27 = vpop.f32.mrf.mxu0 }
 0x940   : > { %v2130_v28 = vsel %vm760_vm2, %v2129_v25, 0.0 }
 0x941   : > { %2131 = vadd.xlane.f32.xlu0 %v2130_v28  ;;  %v2590_v29 = vpop.f32.mrf.mxu0 }
 0x9ca   : > { %v2132_v31 = vpop.xlane.xlu0 %2131 }
 0x9cb   : > { %v2133_v32 = vmul.f32 0.03125, %v2132_v31 }
 0x9cd   : > { %v2134_v8 = vsub.f32 %v2129_v25, %v2133_v32 }
 0x9cf   : > { %v2135_v35 = vmul.f32 %v2134_v8, %v2134_v8 }
 0x9d1   : > { %v2136_v36 = vsel %vm760_vm2, %v2135_v35, 0.0 }
 0x9d2   : > { %2137 = vadd.xlane.f32.xlu0 %v2136_v36 }
 0xa5b   : > { %v2138_v37 = vpop.xlane.xlu0 %2137 }
 0xa5c   : > { %v2139_v38 = vmul.f32 0.03125, %v2138_v37 }
 0xa5e   : > { %v2140_v40 = vadd.f32 1e-05, %v2139_v38 }
 0xa60   : > { %2714 = vrsqrt.f32 %v2140_v40 }
 0xa6d   : > { %v2715_v41 = vpop.eup %2714 }
 0xa6e   : > { %v2142_v34 = vmul.f32 %v2715_v41, %v2134_v8 }
 0xa70   : > { %v2150_v42 = vmul.f32 %v2456_v33, %v2142_v34 }
 0xa72   : > { %v2158_v44 = vadd.f32 %v2457_v26, %v2150_v42 }
 0xa74   : > { %2159 = vst.msk [vmem:[%s3159_s24] sm:$0xff] %vm760_vm2, %v2158_v44 }
 0xa75   : > { %2785 = shalt.err (!%p2782_p1)
}
 0xa76   : > { %s2786_s14 = scalar_lea.hbm %s2172_s8, 128  ;;  %s2790_s12 = scalar_lea.hbm %s3535_s4, 256 }
 0xa77   : > { %p2787_p2 = scmp.ne.s32.totalorder %s2172_s8, %s2786_s14  ;;  %p2791_p0 = scmp.lt.s32.totalorder %s2172_s8, %s3535_s4 }
 0xa78   : > { %p2792_p9 = scmp.lt.s32.totalorder %s2790_s12, %s2786_s14 }
 0xa79   : > { %p2788_p8 = pnand %p2787_p2, %p3027_p10 }
 0xa7a   : > { %p2793_p4 = por %p2792_p9, %p2791_p0 }
 0xa7b   : > { %p2789_p12 = pneg %p2788_p8 }
 0xa7d   : > { %p2794_p13 = pnand %p2793_p4, %p2789_p12 }
 0xa7f   : > { %2797 = shalt.err (!%p2794_p13)
}
 0xa80   : > { %2595 = dma.vmem_to_hbm [thread:$0]  (%p3027_p10), %s2175_s26, 128, %s2172_s8, %s2161_s16  }
 0xa81 PF: > { %s3536_s2 = sld [smem:[#allocation17_spill]] }
 0xa82   : > { %s3537_s23 = sld [smem:[#allocation11_spill]] }
 0xa87   : > { %p2609_p5 = scmp.ge.s32.totalorder %s3536_s2, 2 }
 0xa88   : > { %s2186_s19 = sand.u32 1, %s3537_s23  }
 0xa89   : > { %p2605_p6 = pnand %p2609_p5, %p3033_p11  ;;  %s2187_s18 = scalar_lea.sflag [#allocation4], %s2186_s19 }
 0xa8b   : > { %p2606_p7 = pneg %p2605_p6 }
 0xa8d   : > { %2839 = dma.done.wait (%p2606_p7), %s2187_s18, 128  }
 0xa8e   : > { %2841 = vsyncadd (%p2606_p7), %s2187_s18, 4294967168  ;;  %s33_s20 = sadd.s32 1, %s3536_s2   ;;  %s3539_s29 = sld [smem:[#allocation12_spill]] }
 0xa8f   : > { %p30_p3 = scmp.ge.s32.totalorder %s33_s20, 6   ;;  %s3540_s30 = sld [smem:[#allocation13_spill]] }
 0xa90   : > { %s3541_s15 = sld [smem:[#allocation22_spill]] }
 0xa91   : > { %s3542_s16 = sld [smem:[#allocation15_spill]]  ;;  %32 = sbr.rel (!%p30_p3) target bundleno = 19 (0x13), region = 174 }
 0xa92   : > { %s3543_s17 = sld [smem:[#allocation16_spill]] }
 0xa93   : > { %s3544_s18 = sld [smem:[#allocation18_spill]] }
 0xa94   : > { %s3545_s19 = sld [smem:[#allocation19_spill]] }
 0xa96   :  { %2192 = vsyncpa [#allocation3], 1 }
 0xa97   :  { %2194 = vsyncpa [#allocation3 + $0x1], 1 }
 0xa98   :  { %2195 = vsyncpa [#allocation6], 1 }
 0xa99   :  { %2197 = vsyncpa [#allocation6 + $0x1], 1 }
 0xa9a   :  { %2198 = vsyncpa [#allocation4], 1 }
 0xa9b   :  { %2200 = vsyncpa [#allocation4 + $0x1], 1 }

</bundles_post_ra>
